<compile_context>
chip_gen: v6e
topology: v6e:2x2x1
jax: 0.10.0
libtpu: 0.0.40
codegen_flags: <defaults>
</compile_context>

<pallas_src>
import functools

import jax
import jax.numpy as jnp
from jax import lax
from jax.experimental import pallas as pl
from jax.experimental.pallas import tpu as pltpu

NLE_TERM_CO = 80            # fixed by nethack
VOCAB = 256
HIDDEN = 128
I_DIM = NLE_TERM_CO * VOCAB          # 20480

POS_PER_TILE = 20                    # positions handled per K-grid step
NK = NLE_TERM_CO // POS_PER_TILE     # 4 K steps
K_TILE = POS_PER_TILE * VOCAB        # 5120 W1 rows per step (1.25 MiB bf16)


def _round_up(x, m):
    return (x + m - 1) // m * m


def _elu(x):
    # ELU(alpha=1): x if x > 0 else exp(x) - 1 (clamp exp arg of unselected branch)
    return jnp.where(x > 0, x, jnp.exp(jnp.minimum(x, 0.0)) - 1.0)


def _topline_kernel(msg_ref, w1_ref, b1_ref, w2_ref, b2_ref, out_ref, acc_ref):
    """Grid = (batch tiles [parallel], K tiles [arbitrary]).

    msg_ref : (1, TB, POS_PER_TILE) int32   -- this K tile's message columns
    w1_ref  : (K_TILE, HIDDEN)      bf16    -- this K tile of W1 (double-buffered)
    acc_ref : (TB, HIDDEN)          f32     -- resident accumulator across K
    """
    ki = pl.program_id(1)

    @pl.when(ki == 0)
    def _init():
        acc_ref[...] = jnp.zeros_like(acc_ref)

    msg = msg_ref[0]                                            # (TB, P) int32
    # Hoisted once; reused for every position (JAX does not CSE broadcast_in_dim).
    iota = lax.broadcasted_iota(jnp.int32, (1, VOCAB), 1)       # (1, 256)

    acc = acc_ref[...]
    for p in range(POS_PER_TILE):
        col = msg[:, p:p + 1]                                   # (TB, 1)
        slab = (col == iota).astype(jnp.bfloat16)               # (TB, 256), in vregs
        acc = acc + jnp.dot(slab, w1_ref[p * VOCAB:(p + 1) * VOCAB, :],
                            preferred_element_type=jnp.float32)
    acc_ref[...] = acc

    @pl.when(ki == pl.num_programs(1) - 1)
    def _finalize():
        h1 = _elu(acc_ref[...] + b1_ref[...])                   # (TB, 128)
        h2 = jnp.dot(h1, w2_ref[...], preferred_element_type=jnp.float32)
        out_ref[...] = _elu(h2 + b2_ref[...])


def topline_encoder(message, w1_bf16, b1, w2, b2):
    """message: (B, 80) ints; w1_bf16: (20480,128) bf16 (pre-cast ONCE at setup);
    b1: (1,128) f32; w2: (128,128) f32; b2: (1,128) f32."""
    B = message.shape[0]
    assert message.shape[1] == NLE_TERM_CO
    assert w1_bf16.dtype == jnp.bfloat16, "pre-cast W1 to bf16 once, outside the call path"

    # Pad batch to a multiple of 16 (bf16 sublane packing) and pick a batch tile.
    tb = min(256, _round_up(max(B, 1), 16))
    b_pad = _round_up(B, tb)
    msg = jnp.pad(message.astype(jnp.int32), ((0, b_pad - B), (0, 0)))
    # (NK, B_pad, POS_PER_TILE): tile k holds positions [k*P, (k+1)*P) -> all
    # in-kernel indexing stays static; the grid index_map does the dynamic part.
    msg_tiled = msg.reshape(b_pad, NK, POS_PER_TILE).transpose(1, 0, 2)

    out = pl.pallas_call(
        _topline_kernel,
        out_shape=jax.ShapeDtypeStruct((b_pad, HIDDEN), jnp.float32),
        grid_spec=pltpu.PrefetchScalarGridSpec(
            num_scalar_prefetch=0,
            grid=(b_pad // tb, NK),
            in_specs=[
                # message columns for this (batch, K) tile
                pl.BlockSpec((1, tb, POS_PER_TILE), lambda b, k: (k, b, 0)),
                # W1 K-tile: double-buffered across k -> DMA overlaps compute
                pl.BlockSpec((K_TILE, HIDDEN), lambda b, k: (k, 0)),
                # small params: whole, resident
                pl.BlockSpec((1, HIDDEN), lambda b, k: (0, 0)),
                pl.BlockSpec((HIDDEN, HIDDEN), lambda b, k: (0, 0)),
                pl.BlockSpec((1, HIDDEN), lambda b, k: (0, 0)),
            ],
            out_specs=pl.BlockSpec((tb, HIDDEN), lambda b, k: (b, 0)),
            scratch_shapes=[pltpu.VMEM((tb, HIDDEN), jnp.float32)],
        ),
        compiler_params=pltpu.CompilerParams(
            dimension_semantics=("parallel", "arbitrary")),
    )(msg_tiled, w1_bf16, b1, w2, b2)
    return out[:B]


def _reference(message, w1, b1, w2, b2):
    oh = jax.nn.one_hot(message, VOCAB, dtype=jnp.float32).reshape(-1, I_DIM)
    h1 = jax.nn.elu(oh @ w1 + b1)
    return jax.nn.elu(h1 @ w2 + b2)


if __name__ == "__main__":
    key = jax.random.PRNGKey(0)
    k_msg, k_w1, k_b1, k_w2, k_b2 = jax.random.split(key, 5)

    B = 8
    message = jax.random.randint(k_msg, (B, NLE_TERM_CO), 0, VOCAB, dtype=jnp.int32)

    # Deterministic synthetic parameters, stored as (in_features, out_features).
    w1 = jax.random.normal(k_w1, (I_DIM, HIDDEN), dtype=jnp.float32) * 0.02
    b1 = jax.random.normal(k_b1, (1, HIDDEN), dtype=jnp.float32) * 0.02
    w2 = jax.random.normal(k_w2, (HIDDEN, HIDDEN), dtype=jnp.float32) * 0.05
    b2 = jax.random.normal(k_b2, (1, HIDDEN), dtype=jnp.float32) * 0.05

    # Cast W1 to bf16 ONCE at parameter setup (not per call).
    w1_bf16 = jax.block_until_ready(w1.astype(jnp.bfloat16))

    encoder = jax.jit(topline_encoder)
    out = encoder(message, w1_bf16, b1, w2, b2)
    out = jax.block_until_ready(out)

    ref = _reference(message, w1, b1, w2, b2)
    assert out.shape == (B, HIDDEN)
    # bf16 W1 (kernel) vs f32 W1 (reference): loosened tolerance.
    assert jnp.allclose(out, ref, atol=1e-2, rtol=1e-2), "mismatch vs reference"

    print("KERNEL_OK")
</pallas_src>

<mosaic_0001>
module attributes {stable_mosaic.version = 11 : i64} {
  func.func @_topline_kernel(%arg0: i32, %arg1: i32, %arg2: memref<1x16x20xi32, #tpu.memory_space<vmem>>, %arg3: memref<5120x128xbf16, #tpu.memory_space<vmem>>, %arg4: memref<1x128xf32, #tpu.memory_space<vmem>>, %arg5: memref<128x128xf32, #tpu.memory_space<vmem>>, %arg6: memref<1x128xf32, #tpu.memory_space<vmem>>, %arg7: memref<16x128xf32, #tpu.memory_space<vmem>>, %arg8: memref<16x128xf32, #tpu.memory_space<vmem>>) attributes {dimension_semantics = [#tpu.dimension_semantics<parallel>, #tpu.dimension_semantics<arbitrary>], iteration_bounds = array<i64: 1, 4>, scalar_prefetch = 0 : i64, scratch_operands = 1 : i64, tpu.core_type = #tpu.core_type<tc>, window_params = [{transform_indices = @transform_0, window_bounds = array<i64: 1, 16, 20>}, {transform_indices = @transform_1, window_bounds = array<i64: 5120, 128>}, {pipeline_mode = #tpu.pipeline_mode<synchronous>, transform_indices = @transform_2, window_bounds = array<i64: 1, 128>}, {pipeline_mode = #tpu.pipeline_mode<synchronous>, transform_indices = @transform_3, window_bounds = array<i64: 128, 128>}, {pipeline_mode = #tpu.pipeline_mode<synchronous>, transform_indices = @transform_4, window_bounds = array<i64: 1, 128>}, {transform_indices = @transform_5, window_bounds = array<i64: 16, 128>}]} {
    %c0_i32 = arith.constant 0 : i32
    %0 = arith.cmpi eq, %arg1, %c0_i32 : i32
    %1 = arith.extui %0 : i1 to i32
    %c0_i32_0 = arith.constant 0 : i32
    %2 = arith.cmpi ne, %1, %c0_i32_0 : i32
    scf.if %2 {
      %cst_48 = arith.constant 0.000000e+00 : f32
      %211 = vector.broadcast %cst_48 : f32 to vector<16x128xf32>
      %c0_49 = arith.constant 0 : index
      %c0_50 = arith.constant 0 : index
      %212 = vector.load %arg8[%c0_49, %c0_50] : memref<16x128xf32, #tpu.memory_space<vmem>>, vector<16x128xf32>
      tpu.vector_store %arg8[%c0_49, %c0_50], %211 {strides = array<i32>} : memref<16x128xf32, #tpu.memory_space<vmem>>, vector<16x128xf32>,
    } else {
    }
    %c0 = arith.constant 0 : index
    %c0_1 = arith.constant 0 : index
    %c0_2 = arith.constant 0 : index
    %3 = vector.load %arg2[%c0, %c0_1, %c0_2] : memref<1x16x20xi32, #tpu.memory_space<vmem>>, vector<1x16x20xi32>
    %4 = vector.shape_cast %3 : vector<1x16x20xi32> to vector<16x20xi32>
    %5 = tpu.iota {dimensions = array<i32: 1>} : vector<1x256xi32>
    %c0_3 = arith.constant 0 : index
    %c0_4 = arith.constant 0 : index
    %6 = vector.load %arg8[%c0_3, %c0_4] : memref<16x128xf32, #tpu.memory_space<vmem>>, vector<16x128xf32>
    %7 = vector.extract_strided_slice %4 {offsets = [0, 0], sizes = [16, 1], strides = [1, 1]} : vector<16x20xi32> to vector<16x1xi32>
    %8 = vector.broadcast %7 : vector<16x1xi32> to vector<16x256xi32>
    %9 = vector.broadcast %5 : vector<1x256xi32> to vector<16x256xi32>
    %10 = arith.cmpi eq, %8, %9 : vector<16x256xi32>
    %11 = arith.extui %10 : vector<16x256xi1> to vector<16x256xi32>
    %12 = arith.sitofp %11 : vector<16x256xi32> to vector<16x256xf32>
    %13 = arith.truncf %12 : vector<16x256xf32> to vector<16x256xbf16>
    %c0_5 = arith.constant 0 : index
    %c0_6 = arith.constant 0 : index
    %14 = vector.load %arg3[%c0_5, %c0_6] : memref<5120x128xbf16, #tpu.memory_space<vmem>>, vector<256x128xbf16>
    %cst = arith.constant dense<0.000000e+00> : vector<16x128xf32>
    %15 = tpu.matmul %13, %14, %cst {dimension_numbers = #tpu.dot_dimension_numbers<[1], [0], [0], [1], [0, 0, 1, 1], [], []>} : vector<16x256xbf16>, vector<256x128xbf16>, vector<16x128xf32> -> vector<16x128xf32>
    %16 = arith.addf %6, %15 : vector<16x128xf32>
    %17 = vector.extract_strided_slice %4 {offsets = [0, 1], sizes = [16, 1], strides = [1, 1]} : vector<16x20xi32> to vector<16x1xi32>
    %18 = vector.broadcast %17 : vector<16x1xi32> to vector<16x256xi32>
    %19 = vector.broadcast %5 : vector<1x256xi32> to vector<16x256xi32>
    %20 = arith.cmpi eq, %18, %19 : vector<16x256xi32>
    %21 = arith.extui %20 : vector<16x256xi1> to vector<16x256xi32>
    %22 = arith.sitofp %21 : vector<16x256xi32> to vector<16x256xf32>
    %23 = arith.truncf %22 : vector<16x256xf32> to vector<16x256xbf16>
    %c256 = arith.constant 256 : index
    %c0_7 = arith.constant 0 : index
    %24 = vector.load %arg3[%c256, %c0_7] : memref<5120x128xbf16, #tpu.memory_space<vmem>>, vector<256x128xbf16>
    %cst_8 = arith.constant dense<0.000000e+00> : vector<16x128xf32>
    %25 = tpu.matmul %23, %24, %cst_8 {dimension_numbers = #tpu.dot_dimension_numbers<[1], [0], [0], [1], [0, 0, 1, 1], [], []>} : vector<16x256xbf16>, vector<256x128xbf16>, vector<16x128xf32> -> vector<16x128xf32>
    %26 = arith.addf %16, %25 : vector<16x128xf32>
    %27 = vector.extract_strided_slice %4 {offsets = [0, 2], sizes = [16, 1], strides = [1, 1]} : vector<16x20xi32> to vector<16x1xi32>
    %28 = vector.broadcast %27 : vector<16x1xi32> to vector<16x256xi32>
    %29 = vector.broadcast %5 : vector<1x256xi32> to vector<16x256xi32>
    %30 = arith.cmpi eq, %28, %29 : vector<16x256xi32>
    %31 = arith.extui %30 : vector<16x256xi1> to vector<16x256xi32>
    %32 = arith.sitofp %31 : vector<16x256xi32> to vector<16x256xf32>
    %33 = arith.truncf %32 : vector<16x256xf32> to vector<16x256xbf16>
    %c512 = arith.constant 512 : index
    %c0_9 = arith.constant 0 : index
    %34 = vector.load %arg3[%c512, %c0_9] : memref<5120x128xbf16, #tpu.memory_space<vmem>>, vector<256x128xbf16>
    %cst_10 = arith.constant dense<0.000000e+00> : vector<16x128xf32>
    %35 = tpu.matmul %33, %34, %cst_10 {dimension_numbers = #tpu.dot_dimension_numbers<[1], [0], [0], [1], [0, 0, 1, 1], [], []>} : vector<16x256xbf16>, vector<256x128xbf16>, vector<16x128xf32> -> vector<16x128xf32>
    %36 = arith.addf %26, %35 : vector<16x128xf32>
    %37 = vector.extract_strided_slice %4 {offsets = [0, 3], sizes = [16, 1], strides = [1, 1]} : vector<16x20xi32> to vector<16x1xi32>
    %38 = vector.broadcast %37 : vector<16x1xi32> to vector<16x256xi32>
    %39 = vector.broadcast %5 : vector<1x256xi32> to vector<16x256xi32>
    %40 = arith.cmpi eq, %38, %39 : vector<16x256xi32>
    %41 = arith.extui %40 : vector<16x256xi1> to vector<16x256xi32>
    %42 = arith.sitofp %41 : vector<16x256xi32> to vector<16x256xf32>
    %43 = arith.truncf %42 : vector<16x256xf32> to vector<16x256xbf16>
    %c768 = arith.constant 768 : index
    %c0_11 = arith.constant 0 : index
    %44 = vector.load %arg3[%c768, %c0_11] : memref<5120x128xbf16, #tpu.memory_space<vmem>>, vector<256x128xbf16>
    %cst_12 = arith.constant dense<0.000000e+00> : vector<16x128xf32>
    %45 = tpu.matmul %43, %44, %cst_12 {dimension_numbers = #tpu.dot_dimension_numbers<[1], [0], [0], [1], [0, 0, 1, 1], [], []>} : vector<16x256xbf16>, vector<256x128xbf16>, vector<16x128xf32> -> vector<16x128xf32>
    %46 = arith.addf %36, %45 : vector<16x128xf32>
    %47 = vector.extract_strided_slice %4 {offsets = [0, 4], sizes = [16, 1], strides = [1, 1]} : vector<16x20xi32> to vector<16x1xi32>
    %48 = vector.broadcast %47 : vector<16x1xi32> to vector<16x256xi32>
    %49 = vector.broadcast %5 : vector<1x256xi32> to vector<16x256xi32>
    %50 = arith.cmpi eq, %48, %49 : vector<16x256xi32>
    %51 = arith.extui %50 : vector<16x256xi1> to vector<16x256xi32>
    %52 = arith.sitofp %51 : vector<16x256xi32> to vector<16x256xf32>
    %53 = arith.truncf %52 : vector<16x256xf32> to vector<16x256xbf16>
    %c1024 = arith.constant 1024 : index
    %c0_13 = arith.constant 0 : index
    %54 = vector.load %arg3[%c1024, %c0_13] : memref<5120x128xbf16, #tpu.memory_space<vmem>>, vector<256x128xbf16>
    %cst_14 = arith.constant dense<0.000000e+00> : vector<16x128xf32>
    %55 = tpu.matmul %53, %54, %cst_14 {dimension_numbers = #tpu.dot_dimension_numbers<[1], [0], [0], [1], [0, 0, 1, 1], [], []>} : vector<16x256xbf16>, vector<256x128xbf16>, vector<16x128xf32> -> vector<16x128xf32>
    %56 = arith.addf %46, %55 : vector<16x128xf32>
    %57 = vector.extract_strided_slice %4 {offsets = [0, 5], sizes = [16, 1], strides = [1, 1]} : vector<16x20xi32> to vector<16x1xi32>
    %58 = vector.broadcast %57 : vector<16x1xi32> to vector<16x256xi32>
    %59 = vector.broadcast %5 : vector<1x256xi32> to vector<16x256xi32>
    %60 = arith.cmpi eq, %58, %59 : vector<16x256xi32>
    %61 = arith.extui %60 : vector<16x256xi1> to vector<16x256xi32>
    %62 = arith.sitofp %61 : vector<16x256xi32> to vector<16x256xf32>
    %63 = arith.truncf %62 : vector<16x256xf32> to vector<16x256xbf16>
    %c1280 = arith.constant 1280 : index
    %c0_15 = arith.constant 0 : index
    %64 = vector.load %arg3[%c1280, %c0_15] : memref<5120x128xbf16, #tpu.memory_space<vmem>>, vector<256x128xbf16>
    %cst_16 = arith.constant dense<0.000000e+00> : vector<16x128xf32>
    %65 = tpu.matmul %63, %64, %cst_16 {dimension_numbers = #tpu.dot_dimension_numbers<[1], [0], [0], [1], [0, 0, 1, 1], [], []>} : vector<16x256xbf16>, vector<256x128xbf16>, vector<16x128xf32> -> vector<16x128xf32>
    %66 = arith.addf %56, %65 : vector<16x128xf32>
    %67 = vector.extract_strided_slice %4 {offsets = [0, 6], sizes = [16, 1], strides = [1, 1]} : vector<16x20xi32> to vector<16x1xi32>
    %68 = vector.broadcast %67 : vector<16x1xi32> to vector<16x256xi32>
    %69 = vector.broadcast %5 : vector<1x256xi32> to vector<16x256xi32>
    %70 = arith.cmpi eq, %68, %69 : vector<16x256xi32>
    %71 = arith.extui %70 : vector<16x256xi1> to vector<16x256xi32>
    %72 = arith.sitofp %71 : vector<16x256xi32> to vector<16x256xf32>
    %73 = arith.truncf %72 : vector<16x256xf32> to vector<16x256xbf16>
    %c1536 = arith.constant 1536 : index
    %c0_17 = arith.constant 0 : index
    %74 = vector.load %arg3[%c1536, %c0_17] : memref<5120x128xbf16, #tpu.memory_space<vmem>>, vector<256x128xbf16>
    %cst_18 = arith.constant dense<0.000000e+00> : vector<16x128xf32>
    %75 = tpu.matmul %73, %74, %cst_18 {dimension_numbers = #tpu.dot_dimension_numbers<[1], [0], [0], [1], [0, 0, 1, 1], [], []>} : vector<16x256xbf16>, vector<256x128xbf16>, vector<16x128xf32> -> vector<16x128xf32>
    %76 = arith.addf %66, %75 : vector<16x128xf32>
    %77 = vector.extract_strided_slice %4 {offsets = [0, 7], sizes = [16, 1], strides = [1, 1]} : vector<16x20xi32> to vector<16x1xi32>
    %78 = vector.broadcast %77 : vector<16x1xi32> to vector<16x256xi32>
    %79 = vector.broadcast %5 : vector<1x256xi32> to vector<16x256xi32>
    %80 = arith.cmpi eq, %78, %79 : vector<16x256xi32>
    %81 = arith.extui %80 : vector<16x256xi1> to vector<16x256xi32>
    %82 = arith.sitofp %81 : vector<16x256xi32> to vector<16x256xf32>
    %83 = arith.truncf %82 : vector<16x256xf32> to vector<16x256xbf16>
    %c1792 = arith.constant 1792 : index
    %c0_19 = arith.constant 0 : index
    %84 = vector.load %arg3[%c1792, %c0_19] : memref<5120x128xbf16, #tpu.memory_space<vmem>>, vector<256x128xbf16>
    %cst_20 = arith.constant dense<0.000000e+00> : vector<16x128xf32>
    %85 = tpu.matmul %83, %84, %cst_20 {dimension_numbers = #tpu.dot_dimension_numbers<[1], [0], [0], [1], [0, 0, 1, 1], [], []>} : vector<16x256xbf16>, vector<256x128xbf16>, vector<16x128xf32> -> vector<16x128xf32>
    %86 = arith.addf %76, %85 : vector<16x128xf32>
    %87 = vector.extract_strided_slice %4 {offsets = [0, 8], sizes = [16, 1], strides = [1, 1]} : vector<16x20xi32> to vector<16x1xi32>
    %88 = vector.broadcast %87 : vector<16x1xi32> to vector<16x256xi32>
    %89 = vector.broadcast %5 : vector<1x256xi32> to vector<16x256xi32>
    %90 = arith.cmpi eq, %88, %89 : vector<16x256xi32>
    %91 = arith.extui %90 : vector<16x256xi1> to vector<16x256xi32>
    %92 = arith.sitofp %91 : vector<16x256xi32> to vector<16x256xf32>
    %93 = arith.truncf %92 : vector<16x256xf32> to vector<16x256xbf16>
    %c2048 = arith.constant 2048 : index
    %c0_21 = arith.constant 0 : index
    %94 = vector.load %arg3[%c2048, %c0_21] : memref<5120x128xbf16, #tpu.memory_space<vmem>>, vector<256x128xbf16>
    %cst_22 = arith.constant dense<0.000000e+00> : vector<16x128xf32>
    %95 = tpu.matmul %93, %94, %cst_22 {dimension_numbers = #tpu.dot_dimension_numbers<[1], [0], [0], [1], [0, 0, 1, 1], [], []>} : vector<16x256xbf16>, vector<256x128xbf16>, vector<16x128xf32> -> vector<16x128xf32>
    %96 = arith.addf %86, %95 : vector<16x128xf32>
    %97 = vector.extract_strided_slice %4 {offsets = [0, 9], sizes = [16, 1], strides = [1, 1]} : vector<16x20xi32> to vector<16x1xi32>
    %98 = vector.broadcast %97 : vector<16x1xi32> to vector<16x256xi32>
    %99 = vector.broadcast %5 : vector<1x256xi32> to vector<16x256xi32>
    %100 = arith.cmpi eq, %98, %99 : vector<16x256xi32>
    %101 = arith.extui %100 : vector<16x256xi1> to vector<16x256xi32>
    %102 = arith.sitofp %101 : vector<16x256xi32> to vector<16x256xf32>
    %103 = arith.truncf %102 : vector<16x256xf32> to vector<16x256xbf16>
    %c2304 = arith.constant 2304 : index
    %c0_23 = arith.constant 0 : index
    %104 = vector.load %arg3[%c2304, %c0_23] : memref<5120x128xbf16, #tpu.memory_space<vmem>>, vector<256x128xbf16>
    %cst_24 = arith.constant dense<0.000000e+00> : vector<16x128xf32>
    %105 = tpu.matmul %103, %104, %cst_24 {dimension_numbers = #tpu.dot_dimension_numbers<[1], [0], [0], [1], [0, 0, 1, 1], [], []>} : vector<16x256xbf16>, vector<256x128xbf16>, vector<16x128xf32> -> vector<16x128xf32>
    %106 = arith.addf %96, %105 : vector<16x128xf32>
    %107 = vector.extract_strided_slice %4 {offsets = [0, 10], sizes = [16, 1], strides = [1, 1]} : vector<16x20xi32> to vector<16x1xi32>
    %108 = vector.broadcast %107 : vector<16x1xi32> to vector<16x256xi32>
    %109 = vector.broadcast %5 : vector<1x256xi32> to vector<16x256xi32>
    %110 = arith.cmpi eq, %108, %109 : vector<16x256xi32>
    %111 = arith.extui %110 : vector<16x256xi1> to vector<16x256xi32>
    %112 = arith.sitofp %111 : vector<16x256xi32> to vector<16x256xf32>
    %113 = arith.truncf %112 : vector<16x256xf32> to vector<16x256xbf16>
    %c2560 = arith.constant 2560 : index
    %c0_25 = arith.constant 0 : index
    %114 = vector.load %arg3[%c2560, %c0_25] : memref<5120x128xbf16, #tpu.memory_space<vmem>>, vector<256x128xbf16>
    %cst_26 = arith.constant dense<0.000000e+00> : vector<16x128xf32>
    %115 = tpu.matmul %113, %114, %cst_26 {dimension_numbers = #tpu.dot_dimension_numbers<[1], [0], [0], [1], [0, 0, 1, 1], [], []>} : vector<16x256xbf16>, vector<256x128xbf16>, vector<16x128xf32> -> vector<16x128xf32>
    %116 = arith.addf %106, %115 : vector<16x128xf32>
    %117 = vector.extract_strided_slice %4 {offsets = [0, 11], sizes = [16, 1], strides = [1, 1]} : vector<16x20xi32> to vector<16x1xi32>
    %118 = vector.broadcast %117 : vector<16x1xi32> to vector<16x256xi32>
    %119 = vector.broadcast %5 : vector<1x256xi32> to vector<16x256xi32>
    %120 = arith.cmpi eq, %118, %119 : vector<16x256xi32>
    %121 = arith.extui %120 : vector<16x256xi1> to vector<16x256xi32>
    %122 = arith.sitofp %121 : vector<16x256xi32> to vector<16x256xf32>
    %123 = arith.truncf %122 : vector<16x256xf32> to vector<16x256xbf16>
    %c2816 = arith.constant 2816 : index
    %c0_27 = arith.constant 0 : index
    %124 = vector.load %arg3[%c2816, %c0_27] : memref<5120x128xbf16, #tpu.memory_space<vmem>>, vector<256x128xbf16>
    %cst_28 = arith.constant dense<0.000000e+00> : vector<16x128xf32>
    %125 = tpu.matmul %123, %124, %cst_28 {dimension_numbers = #tpu.dot_dimension_numbers<[1], [0], [0], [1], [0, 0, 1, 1], [], []>} : vector<16x256xbf16>, vector<256x128xbf16>, vector<16x128xf32> -> vector<16x128xf32>
    %126 = arith.addf %116, %125 : vector<16x128xf32>
    %127 = vector.extract_strided_slice %4 {offsets = [0, 12], sizes = [16, 1], strides = [1, 1]} : vector<16x20xi32> to vector<16x1xi32>
    %128 = vector.broadcast %127 : vector<16x1xi32> to vector<16x256xi32>
    %129 = vector.broadcast %5 : vector<1x256xi32> to vector<16x256xi32>
    %130 = arith.cmpi eq, %128, %129 : vector<16x256xi32>
    %131 = arith.extui %130 : vector<16x256xi1> to vector<16x256xi32>
    %132 = arith.sitofp %131 : vector<16x256xi32> to vector<16x256xf32>
    %133 = arith.truncf %132 : vector<16x256xf32> to vector<16x256xbf16>
    %c3072 = arith.constant 3072 : index
    %c0_29 = arith.constant 0 : index
    %134 = vector.load %arg3[%c3072, %c0_29] : memref<5120x128xbf16, #tpu.memory_space<vmem>>, vector<256x128xbf16>
    %cst_30 = arith.constant dense<0.000000e+00> : vector<16x128xf32>
    %135 = tpu.matmul %133, %134, %cst_30 {dimension_numbers = #tpu.dot_dimension_numbers<[1], [0], [0], [1], [0, 0, 1, 1], [], []>} : vector<16x256xbf16>, vector<256x128xbf16>, vector<16x128xf32> -> vector<16x128xf32>
    %136 = arith.addf %126, %135 : vector<16x128xf32>
    %137 = vector.extract_strided_slice %4 {offsets = [0, 13], sizes = [16, 1], strides = [1, 1]} : vector<16x20xi32> to vector<16x1xi32>
    %138 = vector.broadcast %137 : vector<16x1xi32> to vector<16x256xi32>
    %139 = vector.broadcast %5 : vector<1x256xi32> to vector<16x256xi32>
    %140 = arith.cmpi eq, %138, %139 : vector<16x256xi32>
    %141 = arith.extui %140 : vector<16x256xi1> to vector<16x256xi32>
    %142 = arith.sitofp %141 : vector<16x256xi32> to vector<16x256xf32>
    %143 = arith.truncf %142 : vector<16x256xf32> to vector<16x256xbf16>
    %c3328 = arith.constant 3328 : index
    %c0_31 = arith.constant 0 : index
    %144 = vector.load %arg3[%c3328, %c0_31] : memref<5120x128xbf16, #tpu.memory_space<vmem>>, vector<256x128xbf16>
    %cst_32 = arith.constant dense<0.000000e+00> : vector<16x128xf32>
    %145 = tpu.matmul %143, %144, %cst_32 {dimension_numbers = #tpu.dot_dimension_numbers<[1], [0], [0], [1], [0, 0, 1, 1], [], []>} : vector<16x256xbf16>, vector<256x128xbf16>, vector<16x128xf32> -> vector<16x128xf32>
    %146 = arith.addf %136, %145 : vector<16x128xf32>
    %147 = vector.extract_strided_slice %4 {offsets = [0, 14], sizes = [16, 1], strides = [1, 1]} : vector<16x20xi32> to vector<16x1xi32>
    %148 = vector.broadcast %147 : vector<16x1xi32> to vector<16x256xi32>
    %149 = vector.broadcast %5 : vector<1x256xi32> to vector<16x256xi32>
    %150 = arith.cmpi eq, %148, %149 : vector<16x256xi32>
    %151 = arith.extui %150 : vector<16x256xi1> to vector<16x256xi32>
    %152 = arith.sitofp %151 : vector<16x256xi32> to vector<16x256xf32>
    %153 = arith.truncf %152 : vector<16x256xf32> to vector<16x256xbf16>
    %c3584 = arith.constant 3584 : index
    %c0_33 = arith.constant 0 : index
    %154 = vector.load %arg3[%c3584, %c0_33] : memref<5120x128xbf16, #tpu.memory_space<vmem>>, vector<256x128xbf16>
    %cst_34 = arith.constant dense<0.000000e+00> : vector<16x128xf32>
    %155 = tpu.matmul %153, %154, %cst_34 {dimension_numbers = #tpu.dot_dimension_numbers<[1], [0], [0], [1], [0, 0, 1, 1], [], []>} : vector<16x256xbf16>, vector<256x128xbf16>, vector<16x128xf32> -> vector<16x128xf32>
    %156 = arith.addf %146, %155 : vector<16x128xf32>
    %157 = vector.extract_strided_slice %4 {offsets = [0, 15], sizes = [16, 1], strides = [1, 1]} : vector<16x20xi32> to vector<16x1xi32>
    %158 = vector.broadcast %157 : vector<16x1xi32> to vector<16x256xi32>
    %159 = vector.broadcast %5 : vector<1x256xi32> to vector<16x256xi32>
    %160 = arith.cmpi eq, %158, %159 : vector<16x256xi32>
    %161 = arith.extui %160 : vector<16x256xi1> to vector<16x256xi32>
    %162 = arith.sitofp %161 : vector<16x256xi32> to vector<16x256xf32>
    %163 = arith.truncf %162 : vector<16x256xf32> to vector<16x256xbf16>
    %c3840 = arith.constant 3840 : index
    %c0_35 = arith.constant 0 : index
    %164 = vector.load %arg3[%c3840, %c0_35] : memref<5120x128xbf16, #tpu.memory_space<vmem>>, vector<256x128xbf16>
    %cst_36 = arith.constant dense<0.000000e+00> : vector<16x128xf32>
    %165 = tpu.matmul %163, %164, %cst_36 {dimension_numbers = #tpu.dot_dimension_numbers<[1], [0], [0], [1], [0, 0, 1, 1], [], []>} : vector<16x256xbf16>, vector<256x128xbf16>, vector<16x128xf32> -> vector<16x128xf32>
    %166 = arith.addf %156, %165 : vector<16x128xf32>
    %167 = vector.extract_strided_slice %4 {offsets = [0, 16], sizes = [16, 1], strides = [1, 1]} : vector<16x20xi32> to vector<16x1xi32>
    %168 = vector.broadcast %167 : vector<16x1xi32> to vector<16x256xi32>
    %169 = vector.broadcast %5 : vector<1x256xi32> to vector<16x256xi32>
    %170 = arith.cmpi eq, %168, %169 : vector<16x256xi32>
    %171 = arith.extui %170 : vector<16x256xi1> to vector<16x256xi32>
    %172 = arith.sitofp %171 : vector<16x256xi32> to vector<16x256xf32>
    %173 = arith.truncf %172 : vector<16x256xf32> to vector<16x256xbf16>
    %c4096 = arith.constant 4096 : index
    %c0_37 = arith.constant 0 : index
    %174 = vector.load %arg3[%c4096, %c0_37] : memref<5120x128xbf16, #tpu.memory_space<vmem>>, vector<256x128xbf16>
    %cst_38 = arith.constant dense<0.000000e+00> : vector<16x128xf32>
    %175 = tpu.matmul %173, %174, %cst_38 {dimension_numbers = #tpu.dot_dimension_numbers<[1], [0], [0], [1], [0, 0, 1, 1], [], []>} : vector<16x256xbf16>, vector<256x128xbf16>, vector<16x128xf32> -> vector<16x128xf32>
    %176 = arith.addf %166, %175 : vector<16x128xf32>
    %177 = vector.extract_strided_slice %4 {offsets = [0, 17], sizes = [16, 1], strides = [1, 1]} : vector<16x20xi32> to vector<16x1xi32>
    %178 = vector.broadcast %177 : vector<16x1xi32> to vector<16x256xi32>
    %179 = vector.broadcast %5 : vector<1x256xi32> to vector<16x256xi32>
    %180 = arith.cmpi eq, %178, %179 : vector<16x256xi32>
    %181 = arith.extui %180 : vector<16x256xi1> to vector<16x256xi32>
    %182 = arith.sitofp %181 : vector<16x256xi32> to vector<16x256xf32>
    %183 = arith.truncf %182 : vector<16x256xf32> to vector<16x256xbf16>
    %c4352 = arith.constant 4352 : index
    %c0_39 = arith.constant 0 : index
    %184 = vector.load %arg3[%c4352, %c0_39] : memref<5120x128xbf16, #tpu.memory_space<vmem>>, vector<256x128xbf16>
    %cst_40 = arith.constant dense<0.000000e+00> : vector<16x128xf32>
    %185 = tpu.matmul %183, %184, %cst_40 {dimension_numbers = #tpu.dot_dimension_numbers<[1], [0], [0], [1], [0, 0, 1, 1], [], []>} : vector<16x256xbf16>, vector<256x128xbf16>, vector<16x128xf32> -> vector<16x128xf32>
    %186 = arith.addf %176, %185 : vector<16x128xf32>
    %187 = vector.extract_strided_slice %4 {offsets = [0, 18], sizes = [16, 1], strides = [1, 1]} : vector<16x20xi32> to vector<16x1xi32>
    %188 = vector.broadcast %187 : vector<16x1xi32> to vector<16x256xi32>
    %189 = vector.broadcast %5 : vector<1x256xi32> to vector<16x256xi32>
    %190 = arith.cmpi eq, %188, %189 : vector<16x256xi32>
    %191 = arith.extui %190 : vector<16x256xi1> to vector<16x256xi32>
    %192 = arith.sitofp %191 : vector<16x256xi32> to vector<16x256xf32>
    %193 = arith.truncf %192 : vector<16x256xf32> to vector<16x256xbf16>
    %c4608 = arith.constant 4608 : index
    %c0_41 = arith.constant 0 : index
    %194 = vector.load %arg3[%c4608, %c0_41] : memref<5120x128xbf16, #tpu.memory_space<vmem>>, vector<256x128xbf16>
    %cst_42 = arith.constant dense<0.000000e+00> : vector<16x128xf32>
    %195 = tpu.matmul %193, %194, %cst_42 {dimension_numbers = #tpu.dot_dimension_numbers<[1], [0], [0], [1], [0, 0, 1, 1], [], []>} : vector<16x256xbf16>, vector<256x128xbf16>, vector<16x128xf32> -> vector<16x128xf32>
    %196 = arith.addf %186, %195 : vector<16x128xf32>
    %197 = vector.extract_strided_slice %4 {offsets = [0, 19], sizes = [16, 1], strides = [1, 1]} : vector<16x20xi32> to vector<16x1xi32>
    %198 = vector.broadcast %197 : vector<16x1xi32> to vector<16x256xi32>
    %199 = vector.broadcast %5 : vector<1x256xi32> to vector<16x256xi32>
    %200 = arith.cmpi eq, %198, %199 : vector<16x256xi32>
    %201 = arith.extui %200 : vector<16x256xi1> to vector<16x256xi32>
    %202 = arith.sitofp %201 : vector<16x256xi32> to vector<16x256xf32>
    %203 = arith.truncf %202 : vector<16x256xf32> to vector<16x256xbf16>
    %c4864 = arith.constant 4864 : index
    %c0_43 = arith.constant 0 : index
    %204 = vector.load %arg3[%c4864, %c0_43] : memref<5120x128xbf16, #tpu.memory_space<vmem>>, vector<256x128xbf16>
    %cst_44 = arith.constant dense<0.000000e+00> : vector<16x128xf32>
    %205 = tpu.matmul %203, %204, %cst_44 {dimension_numbers = #tpu.dot_dimension_numbers<[1], [0], [0], [1], [0, 0, 1, 1], [], []>} : vector<16x256xbf16>, vector<256x128xbf16>, vector<16x128xf32> -> vector<16x128xf32>
    %206 = arith.addf %196, %205 : vector<16x128xf32>
    %c0_45 = arith.constant 0 : index
    %c0_46 = arith.constant 0 : index
    %207 = vector.load %arg8[%c0_45, %c0_46] : memref<16x128xf32, #tpu.memory_space<vmem>>, vector<16x128xf32>
    tpu.vector_store %arg8[%c0_45, %c0_46], %206 {strides = array<i32>} : memref<16x128xf32, #tpu.memory_space<vmem>>, vector<16x128xf32>,
    %c3_i32 = arith.constant 3 : i32
    %208 = arith.cmpi eq, %arg1, %c3_i32 : i32
    %209 = arith.extui %208 : i1 to i32
    %c0_i32_47 = arith.constant 0 : i32
    %210 = arith.cmpi ne, %209, %c0_i32_47 : i32
    scf.if %210 {
      %c0_48 = arith.constant 0 : index
      %c0_49 = arith.constant 0 : index
      %211 = vector.load %arg8[%c0_48, %c0_49] : memref<16x128xf32, #tpu.memory_space<vmem>>, vector<16x128xf32>
      %c0_50 = arith.constant 0 : index
      %c0_51 = arith.constant 0 : index
      %212 = vector.load %arg4[%c0_50, %c0_51] : memref<1x128xf32, #tpu.memory_space<vmem>>, vector<1x128xf32>
      %213 = vector.broadcast %212 : vector<1x128xf32> to vector<16x128xf32>
      %214 = arith.addf %211, %213 : vector<16x128xf32>
      %cst_52 = arith.constant 0.000000e+00 : f32
      %215 = vector.broadcast %cst_52 : f32 to vector<16x128xf32>
      %216 = arith.cmpf ogt, %214, %215 : vector<16x128xf32>
      %cst_53 = arith.constant 0.000000e+00 : f32
      %217 = vector.broadcast %cst_53 : f32 to vector<16x128xf32>
      %218 = arith.minimumf %214, %217 : vector<16x128xf32>
      %219 = math.exp %218 : vector<16x128xf32>
      %cst_54 = arith.constant 1.000000e+00 : f32
      %220 = vector.broadcast %cst_54 : f32 to vector<16x128xf32>
      %221 = arith.subf %219, %220 : vector<16x128xf32>
      %222 = arith.select %216, %214, %221 : vector<16x128xi1>, vector<16x128xf32>
      %c0_55 = arith.constant 0 : index
      %c0_56 = arith.constant 0 : index
      %223 = vector.load %arg5[%c0_55, %c0_56] : memref<128x128xf32, #tpu.memory_space<vmem>>, vector<128x128xf32>
      %cst_57 = arith.constant dense<0.000000e+00> : vector<16x128xf32>
      %224 = tpu.matmul %222, %223, %cst_57 {dimension_numbers = #tpu.dot_dimension_numbers<[1], [0], [0], [1], [0, 0, 1, 1], [], []>} : vector<16x128xf32>, vector<128x128xf32>, vector<16x128xf32> -> vector<16x128xf32>
      %c0_58 = arith.constant 0 : index
      %c0_59 = arith.constant 0 : index
      %225 = vector.load %arg6[%c0_58, %c0_59] : memref<1x128xf32, #tpu.memory_space<vmem>>, vector<1x128xf32>
      %226 = vector.broadcast %225 : vector<1x128xf32> to vector<16x128xf32>
      %227 = arith.addf %224, %226 : vector<16x128xf32>
      %cst_60 = arith.constant 0.000000e+00 : f32
      %228 = vector.broadcast %cst_60 : f32 to vector<16x128xf32>
      %229 = arith.cmpf ogt, %227, %228 : vector<16x128xf32>
      %cst_61 = arith.constant 0.000000e+00 : f32
      %230 = vector.broadcast %cst_61 : f32 to vector<16x128xf32>
      %231 = arith.minimumf %227, %230 : vector<16x128xf32>
      %232 = math.exp %231 : vector<16x128xf32>
      %cst_62 = arith.constant 1.000000e+00 : f32
      %233 = vector.broadcast %cst_62 : f32 to vector<16x128xf32>
      %234 = arith.subf %232, %233 : vector<16x128xf32>
      %235 = arith.select %229, %227, %234 : vector<16x128xi1>, vector<16x128xf32>
      %c0_63 = arith.constant 0 : index
      %c0_64 = arith.constant 0 : index
      %236 = vector.load %arg7[%c0_63, %c0_64] : memref<16x128xf32, #tpu.memory_space<vmem>>, vector<16x128xf32>
      tpu.vector_store %arg7[%c0_63, %c0_64], %235 {strides = array<i32>} : memref<16x128xf32, #tpu.memory_space<vmem>>, vector<16x128xf32>,
    } else {
    }
    return
  }
  func.func @transform_0(%arg0: i32, %arg1: i32) -> (i32, i32, i32) {
    %c0_i32 = arith.constant 0 : i32
    %c0_i32_0 = arith.constant 0 : i32
    return %arg1, %arg0, %c0_i32 : i32, i32, i32
  }
  func.func @transform_1(%arg0: i32, %arg1: i32) -> (i32, i32) {
    %c0_i32 = arith.constant 0 : i32
    %c0_i32_0 = arith.constant 0 : i32
    return %arg1, %c0_i32 : i32, i32
  }
  func.func @transform_2(%arg0: i32, %arg1: i32) -> (i32, i32) {
    %c0_i32 = arith.constant 0 : i32
    %c0_i32_0 = arith.constant 0 : i32
    %c0_i32_1 = arith.constant 0 : i32
    return %c0_i32, %c0_i32_0 : i32, i32
  }
  func.func @transform_3(%arg0: i32, %arg1: i32) -> (i32, i32) {
    %c0_i32 = arith.constant 0 : i32
    %c0_i32_0 = arith.constant 0 : i32
    %c0_i32_1 = arith.constant 0 : i32
    return %c0_i32, %c0_i32_0 : i32, i32
  }
  func.func @transform_4(%arg0: i32, %arg1: i32) -> (i32, i32) {
    %c0_i32 = arith.constant 0 : i32
    %c0_i32_0 = arith.constant 0 : i32
    %c0_i32_1 = arith.constant 0 : i32
    return %c0_i32, %c0_i32_0 : i32, i32
  }
  func.func @transform_5(%arg0: i32, %arg1: i32) -> (i32, i32) {
    %c0_i32 = arith.constant 0 : i32
    %c0_i32_0 = arith.constant 0 : i32
    return %arg0, %c0_i32 : i32, i32
  }
}

</mosaic_0001>

<bundles_post_ra>
// kernel: topline_encoder.1
= control target key start
LH: loop header
LB: loop body
LE: loop exit
PB: predicated region body
PF: predicated region fallthrough
CT: control target
= control target key end

     0   :  { %10 = vsyncpa [#allocation4], 0  ;;  %s6989_s0 = inlined_call_operand.vmem [shape: s32[4,16,20], index: 0, kind: input, shape index: {}]   ;;  %s6990_s1 = inlined_call_operand.hbm [shape: bf16[20480,128], index: 1, kind: input, shape index: {}]   ;;  %s6991_s2 = inlined_call_operand.hbm [shape: f32[1,128], index: 2, kind: input, shape index: {}]   ;;  %s6992_s3 = inlined_call_operand.hbm [shape: f32[128,128], index: 3, kind: input, shape index: {}]   ;;  %s6993_s4 = inlined_call_operand.hbm [shape: f32[1,128], index: 4, kind: input, shape index: {}]   ;;  %s6994_s5 = inlined_call_operand.vmem [shape: f32[16,128], index: 5, kind: output, shape index: {}]  }
   0x1   :  { %12 = vsyncpa [#allocation4 + $0x1], 0 }
   0x2   :  { %13 = vsyncpa [#allocation6], 0 }
   0x3   :  { %14 = vsyncpa [#allocation9], 0  ;;  %s6133_s18 = smov 0   ;;  %s6135_s19 = smov 0  }
   0x4   :  { %s6137_s20 = smov 0   ;;  %s6139_s21 = smov 0  }
   0x5   :  { %s6141_s22 = smov 0   ;;  %s6143_s23 = smov 0  }
   0x6 LB: > { %s4430_s24 = sadd.s32 4294967295, %s6071_s23   ;;  %p80_p0 = scmp.ne.s32.totalorder %s6055_s19, %s6051_s18  ;;  %s6071_s23 = sphi %s6143_s23, %s20_s23   ;;  %s6067_s22 = sphi %s6141_s22, %s7016_s22   ;;  %s6063_s21 = sphi %s6139_s21, %s7015_s21   ;;  %s6059_s20 = sphi %s6137_s20, %s7014_s20   ;;  %s6055_s19 = sphi %s6135_s19, %s7013_s19   ;;  %s6051_s18 = sphi %s6133_s18, %s7012_s18  }
   0x7   : > { %p6163_p1 = scmp.eq.s32.totalorder %s4430_s24, 0  ;;  %p4431_p2 = scmp.ge.s32.totalorder %s6071_s23, 1 }
   0x8   : > { %p180_p3 = scmp.lt.s32.totalorder %s6071_s23, 5  ;;  %s6073_s28 = smov [#allocation5]  }
   0x9   : > { %p6171_p4 = por %p6163_p1, %p80_p0  ;;  %s193_s29 = sshll.u32 %s6073_s28, 4  ;;  %s194_s29 = int_to_ptr.vmem [resolvable:$true] %s193_s29 }
   0xa   : > { %p6175_p5 = pnand %p4431_p2, %p180_p3  ;;  %s6074_s30 = smov [#allocation7]  }
   0xb   : > { %s203_s6 = sshll.u32 %s6074_s30, 4  ;;  %s6075_s8 = smov [#allocation8]   ;;  %s6187_s6 = int_to_ptr.vmem [resolvable:$true] %s203_s6 }
   0xc   : > { %p5446_p6 = pneg %p6175_p5  ;;  %s217_s9 = sshll.u32 %s6075_s8, 4  ;;  %s218_s9 = int_to_ptr.vmem [resolvable:$true] %s217_s9 }
   0xd   : > { %s5918_s10 = scalar_lea.vmem %s194_s29, 16  ;;  %s5925_s11 = scalar_lea.vmem %s194_s29, 32 }
   0xe   : > { %p6183_p7 = pnand %p5446_p6, %p6163_p1  ;;  %p5919_p9 = scmp.ne.s32.totalorder %s194_s29, %s5918_s10 }
   0xf   : > { %p5926_p12 = scmp.lt.s32.totalorder %s194_s29, %s194_s29  ;;  %p5927_p13 = scmp.lt.s32.totalorder %s5925_s11, %s5918_s10 }
  0x10   : > { %p5909_p8 = pneg %p6183_p7 }
  0x11   : > { %p5928_p0 = por %p5927_p13, %p5926_p12 }
  0x12   : > { %p5921_p10 = pnand %p5919_p9, %p5909_p8 }
  0x14   : > { %p5922_p11 = pneg %p5921_p10 }
  0x16   : > { %p5929_p2 = pnand %p5928_p0, %p5922_p11 }
  0x18   : > { %5932 = shalt.err (!%p5929_p2)
}
  0x19   : > { %5449 = dma.hbm_to_vmem [thread:$0]  (!%p6183_p7), %s6991_s2, 16, %s194_s29, [#allocation6]  }
  0x1a   : > { %s5944_s14 = scalar_lea.vmem %s6187_s6, 2048  ;;  %p5952_p10 = scmp.lt.s32.totalorder %s6187_s6, %s6187_s6 }
  0x1b   : > { %p5945_p3 = scmp.ne.s32.totalorder %s6187_s6, %s5944_s14  ;;  %p5953_p11 = scmp.lt.s32.totalorder %s5944_s14, %s5944_s14 }
  0x1d   : > { %p5947_p6 = pnand %p5945_p3, %p5909_p8  ;;  %p5954_p12 = por %p5953_p11, %p5952_p10 }
  0x1f   : > { %p5948_p9 = pneg %p5947_p6 }
  0x21   : > { %p5955_p13 = pnand %p5954_p12, %p5948_p9 }
  0x23   : > { %5958 = shalt.err (!%p5955_p13)
}
  0x24   : > { %s6076_s15 = smov 128   ;;  %s6077_s16 = smov 8  }
  0x25   : > { %5452 = dma.hbm_to_vmem [thread:$0]  (!%p6183_p7), %s6992_s3, 2048, %s6187_s6, [#allocation6], %s6076_s15, %s6076_s15, %s6077_s16  }
  0x26   : > { %s5970_s24 = scalar_lea.vmem %s218_s9, 16  ;;  %s5977_s28 = scalar_lea.vmem %s218_s9, 32 }
  0x27   : > { %p5971_p0 = scmp.ne.s32.totalorder %s218_s9, %s5970_s24  ;;  %p5978_p6 = scmp.lt.s32.totalorder %s218_s9, %s218_s9 }
  0x28   : > { %p5979_p9 = scmp.lt.s32.totalorder %s5977_s28, %s5970_s24 }
  0x29   : > { %p5973_p2 = pnand %p5971_p0, %p5909_p8 }
  0x2a   : > { %p5980_p10 = por %p5979_p9, %p5978_p6 }
  0x2b   : > { %p5974_p3 = pneg %p5973_p2 }
  0x2d   : > { %p5981_p11 = pnand %p5980_p10, %p5974_p3 }
  0x2f   : > { %5984 = shalt.err (!%p5981_p11)
}
  0x30   : > { %5455 = dma.hbm_to_vmem [thread:$0]  (!%p6183_p7), %s6993_s4, 16, %s218_s9, [#allocation9]  }
  0x31   : > { %s67_s6 = sadd.s32 1, %s6059_s20  ;;  %s29_s8 = sadd.s32 1, %s6067_s22 }
  0x32   : > { %p74_p8 = scmp.ne.s32.totalorder %s6059_s20, %s6055_s19  ;;  %p30_p12 = scmp.ge.s32.totalorder %s29_s8, 4 }
  0x33   : > { %p75_p13 = scmp.eq.s32.totalorder %s6071_s23, 0  ;;  %p5463_p0 = scmp.lt.s32.totalorder %s6071_s23, 4 }
  0x34   : > { %s241_s7 = sand.u32 1, %s6059_s20   ;;  %s7018_s8 = smov (%p30_p12, %s29_s8), 0 }
  0x35   : > { %p76_p2 = por %p75_p13, %p74_p8  ;;  %s64_s10 = ssub.s32 %s6067_s22, %s7018_s8 }
  0x36   : > { %s5430_s11 = smul.u32 2560, %s241_s7  ;;  %p65_p3 = scmp.eq.s32.totalorder %s64_s10, 0 }
  0x37   : > { %s4935_s12 = smul.u32 40960, %s6067_s22  ;;  %p6232_p6 = pnand %p5463_p0, %p76_p2 }
  0x38   : > { %s6237_s9 = scalar_select %p65_p3, %s6059_s20, %s67_s6  }
  0x39   : > { %s251_s16 = scalar_lea.hbm %s6990_s1, %s4935_s12  ;;  %s245_s17 = scalar_lea.vmem [#allocation3], %s5430_s11 }
  0x3a   : > { %s252_s18 = sshll.u32 %s245_s17, 4  ;;  %s242_s24 = scalar_lea.sflag [#allocation4], %s241_s7  ;;  %s253_s18 = int_to_ptr.vmem [resolvable:$true] %s252_s18 }
  0x3b   : > { %p5987_p7 = pneg %p6232_p6  ;;  %s5998_s28 = scalar_lea.vmem %s253_s18, 40960 }
  0x3c   : > { %p5999_p9 = scmp.ne.s32.totalorder %s253_s18, %s5998_s28  ;;  %s6078_s29 = smov [#allocation3]  }
  0x3d   : > { %s6003_s30 = sshll.u32 %s6078_s29, 4  ;;  %s6004_s30 = int_to_ptr.vmem [resolvable:$false] %s6003_s30 }
  0x3e   : > { %p6001_p10 = pnand %p5999_p9, %p5987_p7  ;;  %s6005_s10 = scalar_lea.vmem %s6004_s30, 81920 }
  0x3f   : > { %p6006_p8 = scmp.lt.s32.totalorder %s253_s18, %s6004_s30  ;;  %p6007_p12 = scmp.lt.s32.totalorder %s6005_s10, %s5998_s28 }
  0x40   : > { %p6002_p11 = pneg %p6001_p10 }
  0x41   : > { %p6008_p13 = por %p6007_p12, %p6006_p8 }
  0x43   : > { %p6009_p0 = pnand %p6008_p13, %p6002_p11 }
  0x45   : > { %6012 = shalt.err (!%p6009_p0)
}
  0x46   : > { %s6079_s6 = smov 64   ;;  %s6080_s11 = smov 4  }
  0x47   : > { %5459 = dma.hbm_to_vmem [thread:$0]  (!%p6232_p6), %s251_s16, 40960, %s253_s18, %s242_s24, %s6079_s6, %s6079_s6, %s6080_s11  }
  0x48   : > { %264 = sbr.rel (%p6175_p5) target bundleno = 978 (0x3d2), region = 40 }
  0x4d   : > { %s266_s7 = sand.u32 1, %s6055_s19  }
  0x4e   : > { %s5431_s12 = smul.u32 2560, %s266_s7  ;;  %s267_s14 = scalar_lea.sflag [#allocation4], %s266_s7 }
  0x50   : > { %s6249_s15 = scalar_lea.vmem [#allocation3], %s5431_s12 }
  0x51   : > { %6038 = dma.done.wait (%p6171_p4), %s267_s14, 40960  }
  0x52   : > { %6040 = vsyncadd (%p6171_p4), %s267_s14, 4294926336 }
  0x53   : > { %6042 = dma.done.wait (%p6163_p1), [#allocation6], 2064  }
  0x54   : > { %6044 = vsyncadd (%p6163_p1), [#allocation6], 4294965232 }
  0x55   : > { %6046 = dma.done.wait (%p6163_p1), [#allocation9], 16  }
  0x56   : > { %6048 = vsyncadd (%p6163_p1), [#allocation9], 4294967280  ;;  %p319_p5 = scmp.lt.s32.totalorder %s6063_s21, 3  ;;  %p4443_p4 = scmp.ne.s32.totalorder %s6063_s21, 0 }
  0x58   : > { %s320_s27 = scalar_select %p319_p5, %s6063_s21, 3 }
  0x59   : > { %339 = sbr.rel (%p4443_p4) target bundleno = 96 (0x60), region = 60 }
  0x5a   : > { %s4936_s13 = sshll.u32 %s320_s27, 4 }
  0x5b   : > { %s6268_s17 = scalar_lea.vmem %s6989_s0, %s4936_s13 }
  0x5e   : > { %v6081_v0 = vmov 0.0  }
  0x5f   : > { %340 = vst [vmem:[#allocation2] sm:$0xff] %v6081_v0  ;;  %341 = vst [vmem:[#allocation2 + $0x8] sm:$0xff] %v6081_v0 }
  0x60 PF: > { %v6272_v1 = vld [vmem:[%s6268_s17] sm:$0xff]  ;;  %v6082_v2 = vmov 1   ;;  %v6083_v3 = vmov 0   ;;  %v6275_v4 = vld [vmem:[%s6268_s17 + $0x8] sm:$0xff]  ;;  %v6084_v13 = vmov 2   ;;  %v5585_v14 = vld [vmem:[%s6249_s15 + $0x68] sm:$0xff]   ;;  %v344_v53 = vlaneseq }
  0x61   : > { %5545 = vset.pattern.permute.xlu1 %v6082_v2  ;;  %5544 = vset.pattern.permute.xlu0 %v6083_v3  ;;  %v5577_v5 = vld [vmem:[%s6249_s15 + $0x78] sm:$0xff]   ;;  %v5581_v9 = vld [vmem:[%s6249_s15 + $0x70] sm:$0xff]   ;;  %v5586_v15 = vld [vmem:[%s6249_s15 + $0xe8] sm:$0xff]   ;;  %v6085_v19 = vmov 3   ;;  %v6086_v25 = vmov 4   ;;  %v6087_v26 = vmov 5  }
  0x62   : > { %541 = vperm.xlu1 %5545, %v6272_v1   ;;  %350 = vperm.xlu0 %5544, %v6272_v1   ;;  %v5578_v6 = vld [vmem:[%s6249_s15 + $0xf8] sm:$0xff]   ;;  %v5582_v10 = vld [vmem:[%s6249_s15 + $0xf0] sm:$0xff]   ;;  %v5587_v16 = vld [vmem:[%s6249_s15 + $0x28] sm:$0xff]   ;;  %v6088_v31 = vmov 6   ;;  %v6089_v39 = vmov 8   ;;  %v6090_v45 = vmov 9  }
  0x63   : > { %4937 = vmatprep.subr.bf16.mxu0 %v5577_v5  ;;  %v5579_v7 = vld [vmem:[%s6249_s15 + $0x38] sm:$0xff]   ;;  %4959 = vmatprep.subr.bf16.mxu1 %v5578_v6  ;;  %v5583_v11 = vld [vmem:[%s6249_s15 + $0x30] sm:$0xff]   ;;  %v5588_v17 = vld [vmem:[%s6249_s15 + $0xa8] sm:$0xff]   ;;  %v6091_v46 = vmov 7   ;;  %v6092_v47 = vmov 11   ;;  %v6093_v48 = vmov 10  }
  0x64   : > { %v5580_v8 = vld [vmem:[%s6249_s15 + $0xb8] sm:$0xff]   ;;  %4938 = vmatpush3.bf16.msra.mxu0 %v5579_v7  ;;  %v5584_v12 = vld [vmem:[%s6249_s15 + $0xb0] sm:$0xff]   ;;  %v5589_v18 = vld [vmem:[%s6249_s15 + $0x60] sm:$0xff]   ;;  %v6094_v49 = vmov 12   ;;  %v6095_v50 = vmov 13   ;;  %v6096_v51 = vmov 14  }
  0x65   : > { %4960 = vmatpush3.bf16.msra.mxu1 %v5580_v8  ;;  %4939 = vmatprep.subr.bf16.mxu0 %v5581_v9  ;;  %v5590_v20 = vld [vmem:[%s6249_s15 + $0xe0] sm:$0xff]   ;;  %v5593_v23 = vld [vmem:[%s6249_s15 + $0x58] sm:$0xff]   ;;  %v5597_v29 = vld [vmem:[%s6249_s15 + $0x50] sm:$0xff]   ;;  %v6097_v52 = vmov 15   ;;  %v6343_v54 = vand.u32 127, %v344_v53  ;;  %v6098_v57 = vmov 16  }
  0x66   : > { %544 = vperm.xlu1 %5545, %v6275_v4   ;;  %353 = vperm.xlu0 %5544, %v6275_v4   ;;  %v5591_v21 = vld [vmem:[%s6249_s15 + $0x20] sm:$0xff]   ;;  %v5594_v24 = vld [vmem:[%s6249_s15 + $0xd8] sm:$0xff]   ;;  %v5598_v30 = vld [vmem:[%s6249_s15 + $0xd0] sm:$0xff]   ;;  %v6099_v3 = vmov 1.0|1.0   ;;  %v6100_v8 = vmov 17  }
  0x67   : > { %4961 = vmatprep.subr.bf16.mxu1 %v5582_v10  ;;  %v5592_v22 = vld [vmem:[%s6249_s15 + $0xa0] sm:$0xff]   ;;  %v5595_v27 = vld [vmem:[%s6249_s15 + $0x18] sm:$0xff]   ;;  %v5599_v32 = vld [vmem:[%s6249_s15 + $0x10] sm:$0xff]   ;;  %v6347_v58 = vadd.s32 128, %v6343_v54  ;;  %p4924_p1 = scmp.ne.s32.totalorder %s6063_s21, 3 }
  0x68   : > { %4940 = vmatpush3.bf16.msra.mxu0 %v5583_v11  ;;  %v5596_v28 = vld [vmem:[%s6249_s15 + $0x98] sm:$0xff]   ;;  %v5600_v33 = vld [vmem:[%s6249_s15 + $0x90] sm:$0xff]   ;;  %v5601_v34 = vld [vmem:[%s6249_s15 + $0x48] sm:$0xff]  }
  0x69   : > { %4962 = vmatpush3.bf16.msra.mxu1 %v5584_v12  ;;  %4941 = vmatprep.subr.bf16.mxu0 %v5585_v14  ;;  %v5602_v35 = vld [vmem:[%s6249_s15 + $0xc8] sm:$0xff]   ;;  %v5605_v38 = vld [vmem:[%s6249_s15 + $0x40] sm:$0xff]   ;;  %v5609_v43 = vld [vmem:[%s6249_s15 + $0x178] sm:$0xff]  }
  0x6a   : > { %5547 = vset.pattern.permute.xlu1 %v6084_v13  ;;  %5546 = vset.pattern.permute.xlu0 %v6084_v13  ;;  %v5603_v36 = vld [vmem:[%s6249_s15 + $0x8] sm:$0xff]   ;;  %v5606_v40 = vld [vmem:[%s6249_s15 + $0xc0] sm:$0xff]   ;;  %v5610_v44 = vld [vmem:[%s6249_s15 + $0x1f8] sm:$0xff]  }
  0x6b   : > { %735 = vperm.xlu1 %5547, %v6275_v4   ;;  %732 = vperm.xlu0 %5546, %v6272_v1   ;;  %v5604_v37 = vld [vmem:[%s6249_s15 + $0x88] sm:$0xff]   ;;  %v5607_v41 = vld [vmem:[%s6249_s15] sm:$0xff]   ;;  %v5611_v61 = vld [vmem:[%s6249_s15 + $0x1b8] sm:$0xff]  }
  0x6c   : > { %4963 = vmatprep.subr.bf16.mxu1 %v5586_v15  ;;  %4942 = vmatpush3.bf16.msra.mxu0 %v5587_v16  ;;  %v5608_v42 = vld [vmem:[%s6249_s15 + $0x80] sm:$0xff]   ;;  %v5612_v63 = vld [vmem:[%s6249_s15 + $0x138] sm:$0xff]   ;;  %v5614_v2 = vld [vmem:[%s6249_s15 + $0x1f0] sm:$0xff]  }
  0x6d   : > { %4964 = vmatpush3.bf16.msra.mxu1 %v5588_v17  ;;  %4943 = vmatprep.subr.bf16.mxu0 %v5589_v18  ;;  %v5613_v5 = vld [vmem:[%s6249_s15 + $0x170] sm:$0xff]   ;;  %v5618_v11 = vld [vmem:[%s6249_s15 + $0x1e8] sm:$0xff]   ;;  %v5622_v17 = vld [vmem:[%s6249_s15 + $0x1e0] sm:$0xff]  }
  0x6e   : > { %4965 = vmatprep.subr.bf16.mxu1 %v5590_v20  ;;  %v5615_v9 = vld [vmem:[%s6249_s15 + $0x130] sm:$0xff]   ;;  %v5617_v12 = vld [vmem:[%s6249_s15 + $0x168] sm:$0xff]   ;;  %v5621_v18 = vld [vmem:[%s6249_s15 + $0x160] sm:$0xff]  }
  0x6f   : > { %5548 = vset.pattern.permute.xlu1 %v6085_v19  ;;  %5549 = vset.pattern.permute.xlu0 %v6085_v19  ;;  %v5616_v10 = vld [vmem:[%s6249_s15 + $0x1b0] sm:$0xff]   ;;  %v5619_v13 = vld [vmem:[%s6249_s15 + $0x128] sm:$0xff]   ;;  %v5624_v19 = vld [vmem:[%s6249_s15 + $0x1a0] sm:$0xff]  }
  0x70   : > { %923 = vperm.xlu1 %5548, %v6272_v1   ;;  %926 = vperm.xlu0 %5549, %v6275_v4   ;;  %v5620_v16 = vld [vmem:[%s6249_s15 + $0x1a8] sm:$0xff]   ;;  %v5626_v20 = vld [vmem:[%s6249_s15 + $0x1d8] sm:$0xff]  }
  0x71   : > { %4944 = vmatpush3.bf16.msra.mxu0 %v5591_v21  ;;  %4966 = vmatpush3.bf16.msra.mxu1 %v5592_v22  ;;  %v5625_v21 = vld [vmem:[%s6249_s15 + $0x158] sm:$0xff]   ;;  %v5651_v53 = vld [vmem:[%s6249_s15 + $0x228] sm:$0xff]  }
  0x72   : > { %4945 = vmatprep.subr.bf16.mxu0 %v5593_v23  ;;  %4967 = vmatprep.subr.bf16.mxu1 %v5594_v24  ;;  %v5627_v22 = vld [vmem:[%s6249_s15 + $0x118] sm:$0xff]   ;;  %v5630_v24 = vld [vmem:[%s6249_s15 + $0x1d0] sm:$0xff]  }
  0x73   : > { %v5628_v23 = vld [vmem:[%s6249_s15 + $0x198] sm:$0xff]  }
  0x74   : > { %5550 = vset.pattern.permute.xlu1 %v6086_v25  ;;  %5551 = vset.pattern.permute.xlu0 %v6087_v26  ;;  %v5631_v25 = vld [vmem:[%s6249_s15 + $0x110] sm:$0xff]   ;;  %v5657_v62 = vld [vmem:[%s6249_s15 + $0x258] sm:$0xff]  }
  0x75   : > { %1114 = vperm.xlu1 %5550, %v6272_v1   ;;  %1305 = vperm.xlu0 %5551, %v6272_v1   ;;  %v5660_v0 = vld [vmem:[%s6249_s15 + $0x298] sm:$0xff]  }
  0x76   : > { %4946 = vmatpush3.bf16.msra.mxu0 %v5595_v27  ;;  %4968 = vmatpush3.bf16.msra.mxu1 %v5596_v28  ;;  %v5633_v28 = vld [vmem:[%s6249_s15 + $0x1c8] sm:$0xff]  }
  0x77   : > { %4947 = vmatprep.subr.bf16.mxu0 %v5597_v29  ;;  %4969 = vmatprep.subr.bf16.mxu1 %v5598_v30  ;;  %v5634_v29 = vld [vmem:[%s6249_s15 + $0x148] sm:$0xff]   ;;  %v6101_v30 = vmov 18  }
  0x79   : > { %1117 = vperm.xlu1 %5550, %v6275_v4   ;;  %5554 = vset.pattern.permute.xlu0 %v6088_v31 }
  0x7a   : > { %1499 = vperm.xlu0 %5554, %v6275_v4   ;;  %4948 = vmatpush3.bf16.msra.mxu0 %v5599_v32  ;;  %v5636_v32 = vld [vmem:[%s6249_s15 + $0x188] sm:$0xff]  }
  0x7b   : > { %4970 = vmatpush3.bf16.msra.mxu1 %v5600_v33  ;;  %4949 = vmatprep.subr.bf16.mxu0 %v5601_v34  ;;  %v5897_v33 = vld [vmem:[%s6268_s17] sm:$0xff]  ;;  %v5637_v34 = vld [vmem:[%s6249_s15 + $0x1c0] sm:$0xff]  }
  0x7c   : > { %4971 = vmatprep.subr.bf16.mxu1 %v5602_v35  ;;  %v5638_v35 = vld [vmem:[%s6249_s15 + $0x140] sm:$0xff]  }
  0x7d   : > { %5552 = vset.pattern.permute.xlu1 %v6087_v26  ;;  %v5632_v26 = vld [vmem:[%s6249_s15 + $0x190] sm:$0xff]  }
  0x7e   : > { %1308 = vperm.xlu1 %5552, %v6275_v4   ;;  %5556 = vset.pattern.permute.xlu0 %v6089_v39 }
  0x7f   : > { %1878 = vperm.xlu0 %5556, %v6272_v1   ;;  %4950 = vmatpush3.bf16.msra.mxu0 %v5603_v36 }
  0x80   : > { %4972 = vmatpush3.bf16.msra.mxu1 %v5604_v37  ;;  %4951 = vmatprep.subr.bf16.mxu0 %v5605_v38  ;;  %v5898_v37 = vld [vmem:[%s6268_s17 + $0x8] sm:$0xff]  ;;  %v5639_v38 = vld [vmem:[%s6249_s15 + $0x100] sm:$0xff]  }
  0x81   : > { %4973 = vmatprep.subr.bf16.mxu1 %v5606_v40  ;;  %v5641_v40 = vld [vmem:[%s6249_s15 + $0x2f8] sm:$0xff]  }
  0x82   : > { %5553 = vset.pattern.permute.xlu1 %v6088_v31  ;;  %v5635_v31 = vld [vmem:[%s6249_s15 + $0x108] sm:$0xff]  }
  0x83   : > { %1496 = vperm.xlu1 %5553, %v6272_v1   ;;  %5559 = vset.pattern.permute.xlu0 %v6090_v45 }
  0x84   : > { %4952 = vmatpush3.bf16.msra.mxu0 %v5607_v41  ;;  %2072 = vperm.xlu0 %5559, %v6275_v4   ;;  %v5642_v41 = vld [vmem:[%s6249_s15 + $0x278] sm:$0xff]  }
  0x85   : > { %4974 = vmatpush3.bf16.msra.mxu1 %v5608_v42  ;;  %4981 = vmatprep.subr.bf16.mxu0 %v5609_v43 }
  0x86   : > { %5003 = vmatprep.subr.bf16.mxu1 %v5610_v44  ;;  %v6102_v44 = vmov 19  }
  0x87   : > { %5555 = vset.pattern.permute.xlu1 %v6091_v46  ;;  %v5644_v46 = vld [vmem:[%s6249_s15 + $0x2b8] sm:$0xff]  }
  0x88   : > { %1687 = vperm.xlu1 %5555, %v6272_v1   ;;  %5561 = vset.pattern.permute.xlu0 %v6092_v47 }
  0x89   : > { %2451 = vperm.xlu0 %5561, %v6272_v1  }
  0x8c   : > { %1690 = vperm.xlu1 %5555, %v6275_v4  }
  0x8d   : > { %5564 = vset.pattern.permute.xlu0 %v6094_v49 }
  0x8e   : > { %2645 = vperm.xlu0 %5564, %v6275_v4  }
  0x90   : > { %5557 = vset.pattern.permute.xlu1 %v6089_v39  ;;  %v5640_v39 = vld [vmem:[%s6249_s15 + $0x180] sm:$0xff]  }
  0x91   : > { %1881 = vperm.xlu1 %5557, %v6275_v4  }
  0x92   : > { %5566 = vset.pattern.permute.xlu0 %v6096_v51 }
  0x93   : > { %3024 = vperm.xlu0 %5566, %v6272_v1  }
  0x95   : > { %5558 = vset.pattern.permute.xlu1 %v6090_v45  ;;  %v5643_v45 = vld [vmem:[%s6249_s15 + $0x238] sm:$0xff]  }
  0x96   : > { %2069 = vperm.xlu1 %5558, %v6272_v1  }
  0x97   : > { %5569 = vset.pattern.permute.xlu0 %v6097_v52 }
  0x98   : > { %3218 = vperm.xlu0 %5569, %v6275_v4  }
  0x9a   : > { %5560 = vset.pattern.permute.xlu1 %v6093_v48  ;;  %v5646_v48 = vld [vmem:[%s6249_s15 + $0x2f0] sm:$0xff]  }
  0x9b   : > { %2260 = vperm.xlu1 %5560, %v6272_v1  }
  0x9c   : > { %5571 = vset.pattern.permute.xlu0 %v6100_v8 }
  0x9d   : > { %3597 = vperm.xlu0 %5571, %v6272_v1  }
  0x9f   : > { %2263 = vperm.xlu1 %5560, %v6275_v4  }
  0xa1   : > { %5574 = vset.pattern.permute.xlu0 %v6101_v30 }
  0xa2   : > { %3791 = vperm.xlu0 %5574, %v5898_v37  }
  0xa3   : > { %5562 = vset.pattern.permute.xlu1 %v6092_v47  ;;  %v5645_v47 = vld [vmem:[%s6249_s15 + $0x270] sm:$0xff]  }
  0xa4   : > { %2454 = vperm.xlu1 %5562, %v6275_v4  }
  0xa6   : > { %5576 = vset.pattern.permute.xlu0 %v6102_v44 }
  0xa8   : > { %5563 = vset.pattern.permute.xlu1 %v6094_v49  ;;  %v5648_v49 = vld [vmem:[%s6249_s15 + $0x2b0] sm:$0xff]  }
  0xa9   : > { %2642 = vperm.xlu1 %5563, %v6272_v1  }
  0xad   : > { %5565 = vset.pattern.permute.xlu1 %v6095_v50  ;;  %v5647_v50 = vld [vmem:[%s6249_s15 + $0x230] sm:$0xff]  }
  0xae   : > { %2833 = vperm.xlu1 %5565, %v6272_v1  }
  0xb2   : > { %2836 = vperm.xlu1 %5565, %v6275_v4  }
  0xb6   : > { %5567 = vset.pattern.permute.xlu1 %v6096_v51  ;;  %v5650_v51 = vld [vmem:[%s6249_s15 + $0x2e8] sm:$0xff]  }
  0xb7   : > { %3027 = vperm.xlu1 %5567, %v6275_v4  }
  0xbb   : > { %5568 = vset.pattern.permute.xlu1 %v6097_v52  ;;  %v5649_v52 = vld [vmem:[%s6249_s15 + $0x268] sm:$0xff]  }
  0xbc   : > { %3215 = vperm.xlu1 %5568, %v6272_v1  }
  0xc0   : > { %5570 = vset.pattern.permute.xlu1 %v6098_v57  ;;  %v5653_v57 = vld [vmem:[%s6249_s15 + $0x260] sm:$0xff]  }
  0xc1   : > { %3406 = vperm.xlu1 %5570, %v6272_v1   ;;  %v5623_v1 = vld [vmem:[%s6249_s15 + $0x120] sm:$0xff]  }
  0xc5   : > { %3409 = vperm.xlu1 %5570, %v6275_v4  }
  0xc9   : > { %5572 = vset.pattern.permute.xlu1 %v6100_v8  ;;  %v5664_v8 = vld [vmem:[%s6249_s15 + $0x290] sm:$0xff]  }
  0xca   : > { %3600 = vperm.xlu1 %5572, %v6275_v4   ;;  %v5629_v4 = vld [vmem:[%s6249_s15 + $0x150] sm:$0xff]  }
  0xce   : > { %5573 = vset.pattern.permute.xlu1 %v6101_v30  ;;  %v5686_v30 = vld [vmem:[%s6249_s15 + $0x3e0] sm:$0xff]  }
  0xcf   : > { %3788 = vperm.xlu1 %5573, %v5897_v33  }
  0xd3   : > { %5575 = vset.pattern.permute.xlu1 %v6102_v44  ;;  %v5699_v44 = vld [vmem:[%s6249_s15 + $0x308] sm:$0xff]  }
  0xd4   : > { %3979 = vperm.xlu1 %5575, %v5897_v33   ;;  %v5688_v33 = vld [vmem:[%s6249_s15 + $0x3a0] sm:$0xff]  }
  0xd8   : > { %3982 = vperm.xlu1 %5575, %v5898_v37   ;;  %v5692_v37 = vld [vmem:[%s6249_s15 + $0x398] sm:$0xff]  }
  0xdd   : > { %v542_v55 = vpop.permute.xlu1 %541  ;;  %v351_v56 = vpop.permute.xlu0 %350 }
  0xde   : > { %vm546_vm0 = vcmp.eq.s32.totalorder %v542_v55, %v6343_v54  ;;  %vm355_vm4 = vcmp.eq.s32.totalorder %v351_v56, %v6343_v54  ;;  %vm547_vm8 = vcmp.eq.s32.totalorder %v542_v55, %v6347_v58  ;;  %vm356_vm10 = vcmp.eq.s32.totalorder %v351_v56, %v6347_v58  ;;  %v5652_v55 = vld [vmem:[%s6249_s15 + $0x2a8] sm:$0xff]   ;;  %v5654_v56 = vld [vmem:[%s6249_s15 + $0x2e0] sm:$0xff]  }
  0xe1   : > { %v545_v59 = vpop.permute.xlu1 %544  ;;  %v354_v60 = vpop.permute.xlu0 %353 }
  0xe2   : > { %vm548_vm1 = vcmp.eq.s32.totalorder %v545_v59, %v6343_v54  ;;  %vm357_vm2 = vcmp.eq.s32.totalorder %v354_v60, %v6343_v54  ;;  %vm549_vm3 = vcmp.eq.s32.totalorder %v545_v59, %v6347_v58  ;;  %vm358_vm6 = vcmp.eq.s32.totalorder %v354_v60, %v6347_v58  ;;  %v5655_v59 = vld [vmem:[%s6249_s15 + $0x220] sm:$0xff]  }
  0xe3   : > { %vm6355_vm5 = vmpackc.low %vm548_vm1, %vm546_vm0  ;;  %v5656_v60 = vld [vmem:[%s6249_s15 + $0x2a0] sm:$0xff]  }
  0xe4   : > { %vm6362_vm7 = vmpackc.low %vm357_vm2, %vm355_vm4 }
  0xe5   : > { %vm4488_vm9 = vmpackc.low %vm549_vm3, %vm547_vm8 }
  0xe6   : > { %4489 = vmatprep.mubr.msk.bf16.mxu1 %vm4488_vm9, %v6099_v3  ;;  %vm4464_vm11 = vmpackc.low %vm358_vm6, %vm356_vm10  ;;  %v6371_v6 = vpop.permute.xlu1 %735  ;;  %v6373_v7 = vpop.permute.xlu0 %732 }
  0xe7   : > { %4465 = vmatprep.mubr.msk.bf16.mxu0 %vm4464_vm11, %v6099_v3  ;;  %4491 = vmatmul.mubr.msk.bf16.vlgmr.msra.gmra.mxu1 %vm6355_vm5, %v6099_v3  ;;  %vm740_vm12 = vcmp.eq.s32.totalorder %v6371_v6, %v6347_v58  ;;  %vm738_vm13 = vcmp.eq.s32.totalorder %v6373_v7, %v6347_v58  ;;  %vm739_vm4 = vcmp.eq.s32.totalorder %v6371_v6, %v6343_v54 }
  0xe8   : > { %5004 = vmatpush3.bf16.msra.mxu1 %v5611_v61  ;;  %4467 = vmatmul.mubr.msk.bf16.vlgmr.msra.gmra.mxu0 %vm6362_vm7, %v6099_v3  ;;  %vm4512_vm14 = vmpackc.low %vm740_vm12, %vm738_vm13  ;;  %vm737_vm5 = vcmp.eq.s32.totalorder %v6373_v7, %v6343_v54  ;;  %v5658_v61 = vld [vmem:[%s6249_s15 + $0x2d8] sm:$0xff]   ;;  %v5663_v7 = vld [vmem:[%s6249_s15 + $0x210] sm:$0xff]  }
  0xe9   : > { %4982 = vmatpush3.bf16.msra.mxu0 %v5612_v63  ;;  %5005 = vmatprep.subr.bf16.mxu1 %v5614_v2  ;;  %vm4514_vm11 = vmpackc.low %vm739_vm4, %vm737_vm5  ;;  %v5659_v63 = vld [vmem:[%s6249_s15 + $0x218] sm:$0xff]   ;;  %v5662_v2 = vld [vmem:[%s6249_s15 + $0x2d0] sm:$0xff]  }
  0xea   : > { %4983 = vmatprep.subr.bf16.mxu0 %v5613_v5  ;;  %4513 = vmatprep.mubr.msk.bf16.mxu0 %vm4512_vm14, %v6099_v3  ;;  %v5661_v5 = vld [vmem:[%s6249_s15 + $0x250] sm:$0xff]  }
  0xeb   : > { %v6392_v14 = vpop.permute.xlu1 %923  ;;  %v6394_v15 = vpop.permute.xlu0 %926 }
  0xec   : > { %5006 = vmatpush3.bf16.msra.mxu1 %v5616_v10  ;;  %vm929_vm15 = vcmp.eq.s32.totalorder %v6392_v14, %v6347_v58  ;;  %vm931_vm0 = vcmp.eq.s32.totalorder %v6394_v15, %v6347_v58  ;;  %vm928_vm2 = vcmp.eq.s32.totalorder %v6392_v14, %v6343_v54  ;;  %vm930_vm3 = vcmp.eq.s32.totalorder %v6394_v15, %v6343_v54  ;;  %v5665_v10 = vld [vmem:[%s6249_s15 + $0x248] sm:$0xff]   ;;  %v5670_v14 = vld [vmem:[%s6249_s15 + $0x2c0] sm:$0xff]  }
  0xed   : > { %4984 = vmatpush3.bf16.msra.mxu0 %v5615_v9  ;;  %5007 = vmatprep.subr.bf16.mxu1 %v5618_v11  ;;  %vm4536_vm1 = vmpackc.low %vm931_vm0, %vm929_vm15  ;;  %v5666_v9 = vld [vmem:[%s6249_s15 + $0x2c8] sm:$0xff]   ;;  %v5669_v15 = vld [vmem:[%s6249_s15 + $0x240] sm:$0xff]  }
  0xee   : > { %4985 = vmatprep.subr.bf16.mxu0 %v5617_v12  ;;  %4537 = vmatprep.mubr.msk.bf16.mxu1 %vm4536_vm1, %v6099_v3  ;;  %vm4538_vm6 = vmpackc.low %vm930_vm3, %vm928_vm2  ;;  %v5667_v11 = vld [vmem:[%s6249_s15 + $0x208] sm:$0xff]  }
  0xef   : > { %v5668_v12 = vld [vmem:[%s6249_s15 + $0x288] sm:$0xff]  }
  0xf0   : > { %5008 = vmatpush3.bf16.msra.mxu1 %v5620_v16  ;;  %v6416_v27 = vpop.permute.xlu1 %1114  ;;  %v6438_v43 = vpop.permute.xlu0 %1305  ;;  %v5672_v16 = vld [vmem:[%s6249_s15 + $0x280] sm:$0xff]  }
  0xf1   : > { %4986 = vmatpush3.bf16.msra.mxu0 %v5619_v13  ;;  %5009 = vmatprep.subr.bf16.mxu1 %v5622_v17  ;;  %vm1120_vm7 = vcmp.eq.s32.totalorder %v6416_v27, %v6347_v58  ;;  %vm1311_vm10 = vcmp.eq.s32.totalorder %v6438_v43, %v6347_v58  ;;  %vm1310_vm15 = vcmp.eq.s32.totalorder %v6438_v43, %v6343_v54  ;;  %v5671_v17 = vld [vmem:[%s6249_s15 + $0x200] sm:$0xff]   ;;  %v5697_v43 = vld [vmem:[%s6249_s15 + $0x348] sm:$0xff]  }
  0xf2   : > { %4987 = vmatprep.subr.bf16.mxu0 %v5621_v18  ;;  %v5674_v18 = vld [vmem:[%s6249_s15 + $0x3f8] sm:$0xff]   ;;  %vm1119_vm0 = vcmp.eq.s32.totalorder %v6416_v27, %v6343_v54  ;;  %v5681_v27 = vld [vmem:[%s6249_s15 + $0x368] sm:$0xff]  }
  0xf4   : > { %5010 = vmatpush3.bf16.msra.mxu1 %v5624_v19  ;;  %v6425_v36 = vpop.permute.xlu1 %1117  ;;  %v5673_v19 = vld [vmem:[%s6249_s15 + $0x378] sm:$0xff]  }
  0xf5   : > { %4988 = vmatpush3.bf16.msra.mxu0 %v5623_v1  ;;  %5011 = vmatprep.subr.bf16.mxu1 %v5626_v20  ;;  %vm1122_vm8 = vcmp.eq.s32.totalorder %v6425_v36, %v6347_v58  ;;  %v6504_v1 = vpop.permute.xlu0 %1499  ;;  %vm1121_vm1 = vcmp.eq.s32.totalorder %v6425_v36, %v6343_v54  ;;  %v5691_v36 = vld [vmem:[%s6249_s15 + $0x318] sm:$0xff]  }
  0xf6   : > { %4989 = vmatprep.subr.bf16.mxu0 %v5625_v21  ;;  %vm4560_vm12 = vmpackc.low %vm1122_vm8, %vm1120_vm7  ;;  %v5675_v21 = vld [vmem:[%s6249_s15 + $0x338] sm:$0xff]   ;;  %vm1504_vm4 = vcmp.eq.s32.totalorder %v6504_v1, %v6347_v58 }
  0xf7   : > { %vm4562_vm7 = vmpackc.low %vm1121_vm1, %vm1119_vm0 }
  0xf8   : > { %5012 = vmatpush3.bf16.msra.mxu1 %v5628_v23  ;;  %v5677_v23 = vld [vmem:[%s6249_s15 + $0x370] sm:$0xff]  }
  0xf9   : > { %4990 = vmatpush3.bf16.msra.mxu0 %v5627_v22  ;;  %5013 = vmatprep.subr.bf16.mxu1 %v5630_v24  ;;  %v6436_v42 = vpop.permute.xlu1 %1308  ;;  %v5676_v22 = vld [vmem:[%s6249_s15 + $0x3b8] sm:$0xff]   ;;  %v5678_v24 = vld [vmem:[%s6249_s15 + $0x3f0] sm:$0xff]  }
  0xfa   : > { %4991 = vmatprep.subr.bf16.mxu0 %v5629_v4  ;;  %vm1313_vm9 = vcmp.eq.s32.totalorder %v6436_v42, %v6347_v58  ;;  %vm1312_vm14 = vcmp.eq.s32.totalorder %v6436_v42, %v6343_v54  ;;  %v5679_v4 = vld [vmem:[%s6249_s15 + $0x330] sm:$0xff]   ;;  %v5698_v42 = vld [vmem:[%s6249_s15 + $0x3c8] sm:$0xff]  }
  0xfb   : > { %vm4584_vm13 = vmpackc.low %vm1313_vm9, %vm1311_vm10 }
  0xfc   : > { %5014 = vmatpush3.bf16.msra.mxu1 %v5632_v26  ;;  %vm4586_vm2 = vmpackc.low %vm1312_vm14, %vm1310_vm15  ;;  %v5682_v26 = vld [vmem:[%s6249_s15 + $0x3e8] sm:$0xff]  }
  0xfd   : > { %4992 = vmatpush3.bf16.msra.mxu0 %v5631_v25  ;;  %5015 = vmatprep.subr.bf16.mxu1 %v5633_v28  ;;  %v5680_v25 = vld [vmem:[%s6249_s15 + $0x3b0] sm:$0xff]   ;;  %v5683_v28 = vld [vmem:[%s6249_s15 + $0x328] sm:$0xff]  }
  0xfe   : > { %4993 = vmatprep.subr.bf16.mxu0 %v5634_v29  ;;  %v6485_v6 = vpop.permute.xlu1 %1496  ;;  %v5684_v29 = vld [vmem:[%s6249_s15 + $0x3a8] sm:$0xff]  }
  0xff   : > { %vm1502_vm3 = vcmp.eq.s32.totalorder %v6485_v6, %v6347_v58  ;;  %vm1501_vm10 = vcmp.eq.s32.totalorder %v6485_v6, %v6343_v54  ;;  %v5716_v6 = vld [vmem:[%s6249_s15 + $0x4a8] sm:$0xff]  }
 0x100   : > { %5016 = vmatpush3.bf16.msra.mxu1 %v5636_v32  ;;  %vm4608_vm8 = vmpackc.low %vm1504_vm4, %vm1502_vm3  ;;  %v5687_v32 = vld [vmem:[%s6249_s15 + $0x320] sm:$0xff]  }
 0x101   : > { %4994 = vmatpush3.bf16.msra.mxu0 %v5635_v31  ;;  %5017 = vmatprep.subr.bf16.mxu1 %v5637_v34  ;;  %v5685_v31 = vld [vmem:[%s6249_s15 + $0x360] sm:$0xff]   ;;  %v5690_v34 = vld [vmem:[%s6249_s15 + $0x3d8] sm:$0xff]  }
 0x102   : > { %4995 = vmatprep.subr.bf16.mxu0 %v5638_v35  ;;  %v5689_v35 = vld [vmem:[%s6249_s15 + $0x358] sm:$0xff]  }
 0x103   : > { %v6493_v13 = vpop.permute.xlu1 %1687 }
 0x104   : > { %5018 = vmatpush3.bf16.msra.mxu1 %v5640_v39  ;;  %vm1693_vm5 = vcmp.eq.s32.totalorder %v6493_v13, %v6347_v58  ;;  %v5693_v39 = vld [vmem:[%s6249_s15 + $0x350] sm:$0xff]  }
 0x105   : > { %4996 = vmatpush3.bf16.msra.mxu0 %v5639_v38  ;;  %5047 = vmatprep.subr.bf16.mxu1 %v5641_v40  ;;  %v5694_v38 = vld [vmem:[%s6249_s15 + $0x3d0] sm:$0xff]  }
 0x106   : > { %5025 = vmatprep.subr.bf16.mxu0 %v5642_v41  ;;  %v5695_v40 = vld [vmem:[%s6249_s15 + $0x310] sm:$0xff]  }
 0x107   : > { %4539 = vmatmul.mubr.msk.bf16.vlgmr.msra.gmra.mxu1 %vm4538_vm6, %v6099_v3  ;;  %v6507_v20 = vpop.permute.xlu1 %1690  ;;  %v5696_v41 = vld [vmem:[%s6249_s15 + $0x390] sm:$0xff]  }
 0x108   : > { %4515 = vmatmul.mubr.msk.bf16.vlgmr.msra.gmra.mxu0 %vm4514_vm11, %v6099_v3  ;;  %5048 = vmatpush3.bf16.msra.mxu1 %v5644_v46  ;;  %vm1695_vm6 = vcmp.eq.s32.totalorder %v6507_v20, %v6347_v58  ;;  %vm1503_vm11 = vcmp.eq.s32.totalorder %v6504_v1, %v6343_v54 }
 0x109   : > { %5026 = vmatpush3.bf16.msra.mxu0 %v5643_v45  ;;  %5049 = vmatprep.subr.bf16.mxu1 %v5646_v48  ;;  %vm4632_vm9 = vmpackc.low %vm1695_vm6, %vm1693_vm5  ;;  %v5700_v45 = vld [vmem:[%s6249_s15 + $0x388] sm:$0xff]   ;;  %v5702_v48 = vld [vmem:[%s6249_s15 + $0x3c0] sm:$0xff]  }
 0x10a   : > { %5027 = vmatprep.subr.bf16.mxu0 %v5645_v47  ;;  %4561 = vmatprep.mubr.msk.bf16.mxu0 %vm4560_vm12, %v6099_v3  ;;  %v6553_v47 = vpop.permute.xlu0 %1878  ;;  %vm1692_vm12 = vcmp.eq.s32.totalorder %v6493_v13, %v6343_v54  ;;  %vm4610_vm0 = vmpackc.low %vm1503_vm11, %vm1501_vm10  ;;  %v5723_v13 = vld [vmem:[%s6249_s15 + $0x418] sm:$0xff]  }
 0x10b   : > { %4585 = vmatprep.mubr.msk.bf16.mxu1 %vm4584_vm13, %v6099_v3  ;;  %vm1694_vm13 = vcmp.eq.s32.totalorder %v6507_v20, %v6343_v54  ;;  %vm1884_vm15 = vcmp.eq.s32.totalorder %v6553_v47, %v6347_v58  ;;  %v5729_v20 = vld [vmem:[%s6249_s15 + $0x448] sm:$0xff]  }
 0x10c   : > { %5050 = vmatpush3.bf16.msra.mxu1 %v5648_v49  ;;  %v6551_v46 = vpop.permute.xlu1 %1881  ;;  %v5701_v49 = vld [vmem:[%s6249_s15 + $0x340] sm:$0xff]   ;;  %vm4634_vm3 = vmpackc.low %vm1694_vm13, %vm1692_vm12 }
 0x10d   : > { %5028 = vmatpush3.bf16.msra.mxu0 %v5647_v50  ;;  %5051 = vmatprep.subr.bf16.mxu1 %v5650_v51  ;;  %v5704_v50 = vld [vmem:[%s6249_s15 + $0x380] sm:$0xff]   ;;  %vm1886_vm14 = vcmp.eq.s32.totalorder %v6551_v46, %v6347_v58 }
 0x10e   : > { %5029 = vmatprep.subr.bf16.mxu0 %v5649_v52  ;;  %v5703_v51 = vld [vmem:[%s6249_s15 + $0x300] sm:$0xff]   ;;  %v5706_v52 = vld [vmem:[%s6249_s15 + $0x4f8] sm:$0xff]   ;;  %vm4656_vm4 = vmpackc.low %vm1886_vm14, %vm1884_vm15 }
 0x110   : > { %5052 = vmatpush3.bf16.msra.mxu1 %v5652_v55 }
 0x111   : > { %5030 = vmatpush3.bf16.msra.mxu0 %v5651_v53  ;;  %5053 = vmatprep.subr.bf16.mxu1 %v5654_v56  ;;  %v5705_v53 = vld [vmem:[%s6249_s15 + $0x478] sm:$0xff]   ;;  %v6565_v55 = vpop.permute.xlu1 %2069  ;;  %v6567_v56 = vpop.permute.xlu0 %2072 }
 0x112   : > { %5031 = vmatprep.subr.bf16.mxu0 %v5653_v57  ;;  %v5707_v57 = vld [vmem:[%s6249_s15 + $0x438] sm:$0xff]   ;;  %vm2075_vm1 = vcmp.eq.s32.totalorder %v6565_v55, %v6347_v58  ;;  %vm2074_vm6 = vcmp.eq.s32.totalorder %v6565_v55, %v6343_v54  ;;  %v5762_v55 = vld [vmem:[%s6249_s15 + $0x5c8] sm:$0xff]  }
 0x114   : > { %5054 = vmatpush3.bf16.msra.mxu1 %v5656_v60  ;;  %v5710_v60 = vld [vmem:[%s6249_s15 + $0x4f0] sm:$0xff]  }
 0x115   : > { %5032 = vmatpush3.bf16.msra.mxu0 %v5655_v59  ;;  %5055 = vmatprep.subr.bf16.mxu1 %v5658_v61  ;;  %v5708_v59 = vld [vmem:[%s6249_s15 + $0x4b8] sm:$0xff]   ;;  %v5709_v61 = vld [vmem:[%s6249_s15 + $0x470] sm:$0xff]  }
 0x116   : > { %5033 = vmatprep.subr.bf16.mxu0 %v5657_v62  ;;  %v5711_v62 = vld [vmem:[%s6249_s15 + $0x430] sm:$0xff]   ;;  %v6607_v1 = vpop.permute.xlu1 %2260 }
 0x117   : > { %vm2266_vm11 = vcmp.eq.s32.totalorder %v6607_v1, %v6347_v58 }
 0x118   : > { %5056 = vmatpush3.bf16.msra.mxu1 %v5660_v0  ;;  %v5714_v0 = vld [vmem:[%s6249_s15 + $0x4e8] sm:$0xff]  }
 0x119   : > { %5034 = vmatpush3.bf16.msra.mxu0 %v5659_v63  ;;  %5057 = vmatprep.subr.bf16.mxu1 %v5662_v2  ;;  %v5712_v63 = vld [vmem:[%s6249_s15 + $0x4b0] sm:$0xff]   ;;  %v5713_v2 = vld [vmem:[%s6249_s15 + $0x468] sm:$0xff]  }
 0x11a   : > { %5035 = vmatprep.subr.bf16.mxu0 %v5661_v5  ;;  %v5715_v5 = vld [vmem:[%s6249_s15 + $0x428] sm:$0xff]  }
 0x11c   : > { %5058 = vmatpush3.bf16.msra.mxu1 %v5664_v8  ;;  %v5717_v8 = vld [vmem:[%s6249_s15 + $0x460] sm:$0xff]  }
 0x11d   : > { %5036 = vmatpush3.bf16.msra.mxu0 %v5663_v7  ;;  %5059 = vmatprep.subr.bf16.mxu1 %v5666_v9  ;;  %v5718_v7 = vld [vmem:[%s6249_s15 + $0x4e0] sm:$0xff]  }
 0x11e   : > { %5037 = vmatprep.subr.bf16.mxu0 %v5665_v10  ;;  %v5719_v9 = vld [vmem:[%s6249_s15 + $0x420] sm:$0xff]  }
 0x11f   : > { %v5720_v10 = vld [vmem:[%s6249_s15 + $0x4a0] sm:$0xff]  }
 0x120   : > { %5060 = vmatpush3.bf16.msra.mxu1 %v5668_v12  ;;  %v5721_v12 = vld [vmem:[%s6249_s15 + $0x458] sm:$0xff]  }
 0x121   : > { %5038 = vmatpush3.bf16.msra.mxu0 %v5667_v11  ;;  %5061 = vmatprep.subr.bf16.mxu1 %v5670_v14  ;;  %v5722_v11 = vld [vmem:[%s6249_s15 + $0x4d8] sm:$0xff]  }
 0x122   : > { %5039 = vmatprep.subr.bf16.mxu0 %v5669_v15  ;;  %v5724_v14 = vld [vmem:[%s6249_s15 + $0x498] sm:$0xff]   ;;  %v5726_v15 = vld [vmem:[%s6249_s15 + $0x4d0] sm:$0xff]  }
 0x124   : > { %5062 = vmatpush3.bf16.msra.mxu1 %v5672_v16  ;;  %v5725_v16 = vld [vmem:[%s6249_s15 + $0x450] sm:$0xff]  }
 0x125   : > { %5040 = vmatpush3.bf16.msra.mxu0 %v5671_v17  ;;  %5091 = vmatprep.subr.bf16.mxu1 %v5674_v18  ;;  %v5727_v17 = vld [vmem:[%s6249_s15 + $0x410] sm:$0xff]  }
 0x126   : > { %5069 = vmatprep.subr.bf16.mxu0 %v5673_v19  ;;  %v5728_v18 = vld [vmem:[%s6249_s15 + $0x490] sm:$0xff]   ;;  %v5730_v19 = vld [vmem:[%s6249_s15 + $0x4c8] sm:$0xff]  }
 0x127   : > { %4587 = vmatmul.mubr.msk.bf16.vlgmr.msra.gmra.mxu1 %vm4586_vm2, %v6099_v3  ;;  %vm2077_vm2 = vcmp.eq.s32.totalorder %v6567_v56, %v6347_v58 }
 0x128   : > { %4563 = vmatmul.mubr.msk.bf16.vlgmr.msra.gmra.mxu0 %vm4562_vm7, %v6099_v3  ;;  %5092 = vmatpush3.bf16.msra.mxu1 %v5676_v22  ;;  %vm4680_vm5 = vmpackc.low %vm2077_vm2, %vm2075_vm1  ;;  %v5732_v22 = vld [vmem:[%s6249_s15 + $0x488] sm:$0xff]   ;;  %vm2076_vm7 = vcmp.eq.s32.totalorder %v6567_v56, %v6343_v54 }
 0x129   : > { %5070 = vmatpush3.bf16.msra.mxu0 %v5675_v21  ;;  %5093 = vmatprep.subr.bf16.mxu1 %v5678_v24  ;;  %v5731_v21 = vld [vmem:[%s6249_s15 + $0x408] sm:$0xff]   ;;  %v5733_v24 = vld [vmem:[%s6249_s15 + $0x440] sm:$0xff]   ;;  %vm4682_vm10 = vmpackc.low %vm2076_vm7, %vm2074_vm6 }
 0x12a   : > { %5071 = vmatprep.subr.bf16.mxu0 %v5677_v23  ;;  %4609 = vmatprep.mubr.msk.bf16.mxu0 %vm4608_vm8, %v6099_v3  ;;  %v5734_v23 = vld [vmem:[%s6249_s15 + $0x4c0] sm:$0xff]   ;;  %vm1885_vm8 = vcmp.eq.s32.totalorder %v6551_v46, %v6343_v54  ;;  %v5753_v46 = vld [vmem:[%s6249_s15 + $0x558] sm:$0xff]   ;;  %v5761_v56 = vld [vmem:[%s6249_s15 + $0x548] sm:$0xff]  }
 0x12b   : > { %4633 = vmatprep.mubr.msk.bf16.mxu1 %vm4632_vm9, %v6099_v3  ;;  %vm1883_vm9 = vcmp.eq.s32.totalorder %v6553_v47, %v6343_v54  ;;  %v5755_v47 = vld [vmem:[%s6249_s15 + $0x518] sm:$0xff]  }
 0x12c   : > { %5094 = vmatpush3.bf16.msra.mxu1 %v5680_v25  ;;  %v5735_v25 = vld [vmem:[%s6249_s15 + $0x400] sm:$0xff]   ;;  %vm4658_vm13 = vmpackc.low %vm1885_vm8, %vm1883_vm9 }
 0x12d   : > { %5072 = vmatpush3.bf16.msra.mxu0 %v5679_v4  ;;  %5095 = vmatprep.subr.bf16.mxu1 %v5682_v26  ;;  %v6615_v4 = vpop.permute.xlu1 %2263  ;;  %v5736_v26 = vld [vmem:[%s6249_s15 + $0x480] sm:$0xff]  }
 0x12e   : > { %5073 = vmatprep.subr.bf16.mxu0 %v5681_v27  ;;  %v5738_v27 = vld [vmem:[%s6249_s15 + $0x5f8] sm:$0xff]   ;;  %vm2268_vm12 = vcmp.eq.s32.totalorder %v6615_v4, %v6347_v58 }
 0x130   : > { %5096 = vmatpush3.bf16.msra.mxu1 %v5684_v29 }
 0x131   : > { %5074 = vmatpush3.bf16.msra.mxu0 %v5683_v28  ;;  %5097 = vmatprep.subr.bf16.mxu1 %v5686_v30  ;;  %v5737_v28 = vld [vmem:[%s6249_s15 + $0x578] sm:$0xff]   ;;  %v6629_v29 = vpop.permute.xlu1 %2454  ;;  %v6631_v30 = vpop.permute.xlu0 %2451 }
 0x132   : > { %5075 = vmatprep.subr.bf16.mxu0 %v5685_v31  ;;  %v5739_v31 = vld [vmem:[%s6249_s15 + $0x538] sm:$0xff]   ;;  %vm2459_vm14 = vcmp.eq.s32.totalorder %v6629_v29, %v6347_v58  ;;  %vm2457_vm15 = vcmp.eq.s32.totalorder %v6631_v30, %v6347_v58  ;;  %vm2458_vm2 = vcmp.eq.s32.totalorder %v6629_v29, %v6343_v54  ;;  %v5792_v29 = vld [vmem:[%s6249_s15 + $0x690] sm:$0xff]  }
 0x133   : > { %vm4728_vm1 = vmpackc.low %vm2459_vm14, %vm2457_vm15 }
 0x134   : > { %5098 = vmatpush3.bf16.msra.mxu1 %v5688_v33  ;;  %v5741_v33 = vld [vmem:[%s6249_s15 + $0x570] sm:$0xff]  }
 0x135   : > { %5076 = vmatpush3.bf16.msra.mxu0 %v5687_v32  ;;  %5099 = vmatprep.subr.bf16.mxu1 %v5690_v34  ;;  %v5740_v32 = vld [vmem:[%s6249_s15 + $0x5b8] sm:$0xff]   ;;  %v5742_v34 = vld [vmem:[%s6249_s15 + $0x5f0] sm:$0xff]  }
 0x136   : > { %5077 = vmatprep.subr.bf16.mxu0 %v5689_v35  ;;  %v5744_v35 = vld [vmem:[%s6249_s15 + $0x5b0] sm:$0xff]  }
 0x138   : > { %5100 = vmatpush3.bf16.msra.mxu1 %v5692_v37  ;;  %v5746_v37 = vld [vmem:[%s6249_s15 + $0x5e8] sm:$0xff]  }
 0x139   : > { %5078 = vmatpush3.bf16.msra.mxu0 %v5691_v36  ;;  %5101 = vmatprep.subr.bf16.mxu1 %v5694_v38  ;;  %v5743_v36 = vld [vmem:[%s6249_s15 + $0x530] sm:$0xff]   ;;  %v5745_v38 = vld [vmem:[%s6249_s15 + $0x568] sm:$0xff]  }
 0x13a   : > { %5079 = vmatprep.subr.bf16.mxu0 %v5693_v39  ;;  %v5747_v39 = vld [vmem:[%s6249_s15 + $0x528] sm:$0xff]  }
 0x13c   : > { %5102 = vmatpush3.bf16.msra.mxu1 %v5696_v41  ;;  %v5750_v41 = vld [vmem:[%s6249_s15 + $0x5e0] sm:$0xff]  }
 0x13d   : > { %5080 = vmatpush3.bf16.msra.mxu0 %v5695_v40  ;;  %5103 = vmatprep.subr.bf16.mxu1 %v5698_v42  ;;  %v5748_v40 = vld [vmem:[%s6249_s15 + $0x5a8] sm:$0xff]   ;;  %v5749_v42 = vld [vmem:[%s6249_s15 + $0x560] sm:$0xff]  }
 0x13e   : > { %5081 = vmatprep.subr.bf16.mxu0 %v5697_v43  ;;  %v5751_v43 = vld [vmem:[%s6249_s15 + $0x520] sm:$0xff]  }
 0x140   : > { %5104 = vmatpush3.bf16.msra.mxu1 %v5700_v45  ;;  %v5754_v45 = vld [vmem:[%s6249_s15 + $0x5d8] sm:$0xff]  }
 0x141   : > { %5082 = vmatpush3.bf16.msra.mxu0 %v5699_v44  ;;  %5105 = vmatprep.subr.bf16.mxu1 %v5702_v48  ;;  %v5752_v44 = vld [vmem:[%s6249_s15 + $0x5a0] sm:$0xff]   ;;  %v5756_v48 = vld [vmem:[%s6249_s15 + $0x598] sm:$0xff]  }
 0x142   : > { %5083 = vmatprep.subr.bf16.mxu0 %v5701_v49  ;;  %v5758_v49 = vld [vmem:[%s6249_s15 + $0x5d0] sm:$0xff]  }
 0x144   : > { %5106 = vmatpush3.bf16.msra.mxu1 %v5704_v50  ;;  %v5757_v50 = vld [vmem:[%s6249_s15 + $0x550] sm:$0xff]  }
 0x145   : > { %5084 = vmatpush3.bf16.msra.mxu0 %v5703_v51  ;;  %5135 = vmatprep.subr.bf16.mxu1 %v5706_v52  ;;  %v6665_v51 = vpop.permute.xlu1 %2642  ;;  %v5759_v52 = vld [vmem:[%s6249_s15 + $0x510] sm:$0xff]  }
 0x146   : > { %5113 = vmatprep.subr.bf16.mxu0 %v5705_v53  ;;  %v5760_v53 = vld [vmem:[%s6249_s15 + $0x590] sm:$0xff]   ;;  %vm2648_vm8 = vcmp.eq.s32.totalorder %v6665_v51, %v6347_v58  ;;  %vm2647_vm14 = vcmp.eq.s32.totalorder %v6665_v51, %v6343_v54  ;;  %v5810_v51 = vld [vmem:[%s6249_s15 + $0x7e8] sm:$0xff]  }
 0x147   : > { %4635 = vmatmul.mubr.msk.bf16.vlgmr.msra.gmra.mxu1 %vm4634_vm3, %v6099_v3  ;;  %vm2456_vm3 = vcmp.eq.s32.totalorder %v6631_v30, %v6343_v54  ;;  %v5794_v30 = vld [vmem:[%s6249_s15 + $0x6c8] sm:$0xff]  }
 0x148   : > { %4611 = vmatmul.mubr.msk.bf16.vlgmr.msra.gmra.mxu0 %vm4610_vm0, %v6099_v3  ;;  %5136 = vmatpush3.bf16.msra.mxu1 %v5708_v59  ;;  %vm4704_vm0 = vmpackc.low %vm2268_vm12, %vm2266_vm11  ;;  %v5764_v59 = vld [vmem:[%s6249_s15 + $0x588] sm:$0xff]  }
 0x149   : > { %5114 = vmatpush3.bf16.msra.mxu0 %v5707_v57  ;;  %5137 = vmatprep.subr.bf16.mxu1 %v5710_v60  ;;  %v5763_v57 = vld [vmem:[%s6249_s15 + $0x508] sm:$0xff]   ;;  %v5765_v60 = vld [vmem:[%s6249_s15 + $0x540] sm:$0xff]   ;;  %vm6685_vm6 = vmpackc.low %vm2458_vm2, %vm2456_vm3 }
 0x14a   : > { %5115 = vmatprep.subr.bf16.mxu0 %v5709_v61  ;;  %4657 = vmatprep.mubr.msk.bf16.mxu0 %vm4656_vm4, %v6099_v3  ;;  %vm2265_vm4 = vcmp.eq.s32.totalorder %v6607_v1, %v6343_v54  ;;  %v6682_v61 = vpop.permute.xlu1 %2833  ;;  %v5780_v1 = vld [vmem:[%s6249_s15 + $0x6a8] sm:$0xff]  }
 0x14b   : > { %4681 = vmatprep.mubr.msk.bf16.mxu1 %vm4680_vm5, %v6099_v3  ;;  %vm2267_vm5 = vcmp.eq.s32.totalorder %v6615_v4, %v6343_v54  ;;  %v5787_v4 = vld [vmem:[%s6249_s15 + $0x618] sm:$0xff]  }
 0x14c   : > { %5138 = vmatpush3.bf16.msra.mxu1 %v5712_v63  ;;  %vm6689_vm7 = vmpackc.low %vm2267_vm5, %vm2265_vm4  ;;  %v5820_v63 = vld [vmem:[%s6249_s15 + $0x798] sm:$0xff]  }
 0x14d   : > { %5116 = vmatpush3.bf16.msra.mxu0 %v5711_v62  ;;  %5139 = vmatprep.subr.bf16.mxu1 %v5714_v0  ;;  %v5766_v62 = vld [vmem:[%s6249_s15 + $0x5c0] sm:$0xff]   ;;  %v5819_v0 = vld [vmem:[%s6249_s15 + $0x718] sm:$0xff]  }
 0x14e   : > { %5117 = vmatprep.subr.bf16.mxu0 %v5713_v2  ;;  %v5767_v2 = vld [vmem:[%s6249_s15 + $0x500] sm:$0xff]  }
 0x150   : > { %5140 = vmatpush3.bf16.msra.mxu1 %v5716_v6  ;;  %v5770_v6 = vld [vmem:[%s6249_s15 + $0x6f8] sm:$0xff]  }
 0x151   : > { %5118 = vmatpush3.bf16.msra.mxu0 %v5715_v5  ;;  %5141 = vmatprep.subr.bf16.mxu1 %v5718_v7  ;;  %v5768_v5 = vld [vmem:[%s6249_s15 + $0x580] sm:$0xff]   ;;  %v6696_v7 = vpop.permute.xlu0 %2645 }
 0x152   : > { %5119 = vmatprep.subr.bf16.mxu0 %v5717_v8  ;;  %v5769_v8 = vld [vmem:[%s6249_s15 + $0x678] sm:$0xff]   ;;  %vm2650_vm9 = vcmp.eq.s32.totalorder %v6696_v7, %v6347_v58  ;;  %vm2649_vm15 = vcmp.eq.s32.totalorder %v6696_v7, %v6343_v54 }
 0x153   : > { %vm4752_vm12 = vmpackc.low %vm2650_vm9, %vm2648_vm8 }
 0x154   : > { %5142 = vmatpush3.bf16.msra.mxu1 %v5720_v10  ;;  %v5771_v10 = vld [vmem:[%s6249_s15 + $0x638] sm:$0xff]  }
 0x155   : > { %5120 = vmatpush3.bf16.msra.mxu0 %v5719_v9  ;;  %5143 = vmatprep.subr.bf16.mxu1 %v5722_v11  ;;  %v6699_v9 = vpop.permute.xlu1 %2836  ;;  %v5772_v11 = vld [vmem:[%s6249_s15 + $0x6b8] sm:$0xff]  }
 0x156   : > { %5121 = vmatprep.subr.bf16.mxu0 %v5721_v12  ;;  %v5774_v12 = vld [vmem:[%s6249_s15 + $0x6f0] sm:$0xff]   ;;  %vm2841_vm11 = vcmp.eq.s32.totalorder %v6699_v9, %v6347_v58  ;;  %vm2840_vm2 = vcmp.eq.s32.totalorder %v6699_v9, %v6343_v54  ;;  %v5826_v9 = vld [vmem:[%s6249_s15 + $0x7c8] sm:$0xff]  }
 0x158   : > { %5144 = vmatpush3.bf16.msra.mxu1 %v5724_v14  ;;  %v5776_v14 = vld [vmem:[%s6249_s15 + $0x6b0] sm:$0xff]  }
 0x159   : > { %5122 = vmatpush3.bf16.msra.mxu0 %v5723_v13  ;;  %5145 = vmatprep.subr.bf16.mxu1 %v5726_v15  ;;  %v5773_v13 = vld [vmem:[%s6249_s15 + $0x670] sm:$0xff]  }
 0x15a   : > { %5123 = vmatprep.subr.bf16.mxu0 %v5725_v16  ;;  %v5775_v15 = vld [vmem:[%s6249_s15 + $0x630] sm:$0xff]   ;;  %v5778_v16 = vld [vmem:[%s6249_s15 + $0x6e8] sm:$0xff]  }
 0x15c   : > { %5146 = vmatpush3.bf16.msra.mxu1 %v5728_v18  ;;  %v5779_v18 = vld [vmem:[%s6249_s15 + $0x628] sm:$0xff]  }
 0x15d   : > { %5124 = vmatpush3.bf16.msra.mxu0 %v5727_v17  ;;  %5147 = vmatprep.subr.bf16.mxu1 %v5730_v19  ;;  %v5777_v17 = vld [vmem:[%s6249_s15 + $0x668] sm:$0xff]   ;;  %v5782_v19 = vld [vmem:[%s6249_s15 + $0x6e0] sm:$0xff]  }
 0x15e   : > { %5125 = vmatprep.subr.bf16.mxu0 %v5729_v20  ;;  %v5781_v20 = vld [vmem:[%s6249_s15 + $0x660] sm:$0xff]  }
 0x160   : > { %5148 = vmatpush3.bf16.msra.mxu1 %v5732_v22  ;;  %v5784_v22 = vld [vmem:[%s6249_s15 + $0x6a0] sm:$0xff]  }
 0x161   : > { %5126 = vmatpush3.bf16.msra.mxu0 %v5731_v21  ;;  %5149 = vmatprep.subr.bf16.mxu1 %v5734_v23  ;;  %v5783_v21 = vld [vmem:[%s6249_s15 + $0x620] sm:$0xff]   ;;  %v5786_v23 = vld [vmem:[%s6249_s15 + $0x6d8] sm:$0xff]  }
 0x162   : > { %5127 = vmatprep.subr.bf16.mxu0 %v5733_v24  ;;  %v5785_v24 = vld [vmem:[%s6249_s15 + $0x658] sm:$0xff]  }
 0x164   : > { %5150 = vmatpush3.bf16.msra.mxu1 %v5736_v26  ;;  %v5790_v26 = vld [vmem:[%s6249_s15 + $0x6d0] sm:$0xff]  }
 0x165   : > { %5128 = vmatpush3.bf16.msra.mxu0 %v5735_v25  ;;  %5179 = vmatprep.subr.bf16.mxu1 %v5738_v27  ;;  %v5788_v25 = vld [vmem:[%s6249_s15 + $0x698] sm:$0xff]   ;;  %v5789_v27 = vld [vmem:[%s6249_s15 + $0x650] sm:$0xff]  }
 0x166   : > { %5157 = vmatprep.subr.bf16.mxu0 %v5737_v28  ;;  %v5791_v28 = vld [vmem:[%s6249_s15 + $0x610] sm:$0xff]  }
 0x167   : > { %4683 = vmatmul.mubr.msk.bf16.vlgmr.msra.gmra.mxu1 %vm4682_vm10, %v6099_v3  ;;  %vm2839_vm10 = vcmp.eq.s32.totalorder %v6682_v61, %v6347_v58 }
 0x168   : > { %4659 = vmatmul.mubr.msk.bf16.vlgmr.msra.gmra.mxu0 %vm4658_vm13, %v6099_v3  ;;  %5180 = vmatpush3.bf16.msra.mxu1 %v5740_v32  ;;  %vm4776_vm13 = vmpackc.low %vm2841_vm11, %vm2839_vm10  ;;  %v5795_v32 = vld [vmem:[%s6249_s15 + $0x608] sm:$0xff]  }
 0x169   : > { %5158 = vmatpush3.bf16.msra.mxu0 %v5739_v31  ;;  %5181 = vmatprep.subr.bf16.mxu1 %v5742_v34  ;;  %v5793_v31 = vld [vmem:[%s6249_s15 + $0x648] sm:$0xff]   ;;  %v6747_v34 = vpop.permute.xlu1 %3027 }
 0x16a   : > { %5159 = vmatprep.subr.bf16.mxu0 %v5741_v33  ;;  %4705 = vmatprep.mubr.msk.bf16.mxu0 %vm4704_vm0, %v6099_v3  ;;  %v5796_v33 = vld [vmem:[%s6249_s15 + $0x688] sm:$0xff]   ;;  %vm6753_vm0 = vmpackc.low %vm2649_vm15, %vm2647_vm14  ;;  %vm3032_vm3 = vcmp.eq.s32.totalorder %v6747_v34, %v6347_v58 }
 0x16b   : > { %4729 = vmatprep.mubr.msk.bf16.mxu1 %vm4728_vm1, %v6099_v3  ;;  %vm2838_vm1 = vcmp.eq.s32.totalorder %v6682_v61, %v6343_v54  ;;  %v5818_v61 = vld [vmem:[%s6249_s15 + $0x7d8] sm:$0xff]  }
 0x16c   : > { %5182 = vmatpush3.bf16.msra.mxu1 %v5744_v35  ;;  %v6749_v35 = vpop.permute.xlu0 %3024 }
 0x16d   : > { %5160 = vmatpush3.bf16.msra.mxu0 %v5743_v36  ;;  %5183 = vmatprep.subr.bf16.mxu1 %v5746_v37  ;;  %v5798_v36 = vld [vmem:[%s6249_s15 + $0x6c0] sm:$0xff]   ;;  %vm3030_vm4 = vcmp.eq.s32.totalorder %v6749_v35, %v6347_v58 }
 0x16e   : > { %5161 = vmatprep.subr.bf16.mxu0 %v5745_v38  ;;  %v5797_v37 = vld [vmem:[%s6249_s15 + $0x640] sm:$0xff]   ;;  %vm4800_vm8 = vmpackc.low %vm3032_vm3, %vm3030_vm4  ;;  %v5854_v38 = vld [vmem:[%s6249_s15 + $0x8d0] sm:$0xff]  }
 0x170   : > { %5184 = vmatpush3.bf16.msra.mxu1 %v5748_v40  ;;  %v5800_v40 = vld [vmem:[%s6249_s15 + $0x680] sm:$0xff]  }
 0x171   : > { %5162 = vmatpush3.bf16.msra.mxu0 %v5747_v39  ;;  %5185 = vmatprep.subr.bf16.mxu1 %v5750_v41  ;;  %v5799_v39 = vld [vmem:[%s6249_s15 + $0x600] sm:$0xff]   ;;  %v5802_v41 = vld [vmem:[%s6249_s15 + $0x7f8] sm:$0xff]  }
 0x172   : > { %5163 = vmatprep.subr.bf16.mxu0 %v5749_v42  ;;  %v5801_v42 = vld [vmem:[%s6249_s15 + $0x778] sm:$0xff]  }
 0x174   : > { %5186 = vmatpush3.bf16.msra.mxu1 %v5752_v44  ;;  %v6763_v44 = vpop.permute.xlu0 %3218 }
 0x175   : > { %5164 = vmatpush3.bf16.msra.mxu0 %v5751_v43  ;;  %5187 = vmatprep.subr.bf16.mxu1 %v5754_v45  ;;  %v6761_v43 = vpop.permute.xlu1 %3215  ;;  %v5803_v45 = vld [vmem:[%s6249_s15 + $0x738] sm:$0xff]   ;;  %vm3222_vm11 = vcmp.eq.s32.totalorder %v6763_v44, %v6343_v54 }
 0x176   : > { %5165 = vmatprep.subr.bf16.mxu0 %v5753_v46  ;;  %v5804_v46 = vld [vmem:[%s6249_s15 + $0x7b8] sm:$0xff]   ;;  %vm3221_vm5 = vcmp.eq.s32.totalorder %v6761_v43, %v6347_v58  ;;  %vm3220_vm10 = vcmp.eq.s32.totalorder %v6761_v43, %v6343_v54  ;;  %v5858_v43 = vld [vmem:[%s6249_s15 + $0x8c8] sm:$0xff]  }
 0x177   : > { %vm4826_vm14 = vmpackc.low %vm3222_vm11, %vm3220_vm10 }
 0x178   : > { %5188 = vmatpush3.bf16.msra.mxu1 %v5756_v48  ;;  %v5805_v48 = vld [vmem:[%s6249_s15 + $0x770] sm:$0xff]  }
 0x179   : > { %5166 = vmatpush3.bf16.msra.mxu0 %v5755_v47  ;;  %5189 = vmatprep.subr.bf16.mxu1 %v5758_v49  ;;  %v5806_v47 = vld [vmem:[%s6249_s15 + $0x7f0] sm:$0xff]   ;;  %v6804_v7 = vpop.permute.xlu1 %3406 }
 0x17a   : > { %5167 = vmatprep.subr.bf16.mxu0 %v5757_v50  ;;  %v5807_v49 = vld [vmem:[%s6249_s15 + $0x730] sm:$0xff]   ;;  %vm3412_vm15 = vcmp.eq.s32.totalorder %v6804_v7, %v6347_v58 }
 0x17b   : > { %v5808_v50 = vld [vmem:[%s6249_s15 + $0x7b0] sm:$0xff]  }
 0x17c   : > { %5190 = vmatpush3.bf16.msra.mxu1 %v5760_v53  ;;  %v5811_v53 = vld [vmem:[%s6249_s15 + $0x728] sm:$0xff]  }
 0x17d   : > { %5168 = vmatpush3.bf16.msra.mxu0 %v5759_v52  ;;  %5191 = vmatprep.subr.bf16.mxu1 %v5762_v55  ;;  %v5809_v52 = vld [vmem:[%s6249_s15 + $0x768] sm:$0xff]  }
 0x17e   : > { %5169 = vmatprep.subr.bf16.mxu0 %v5761_v56  ;;  %v5812_v55 = vld [vmem:[%s6249_s15 + $0x7a8] sm:$0xff]   ;;  %v5814_v56 = vld [vmem:[%s6249_s15 + $0x7e0] sm:$0xff]  }
 0x180   : > { %5192 = vmatpush3.bf16.msra.mxu1 %v5764_v59  ;;  %v5816_v59 = vld [vmem:[%s6249_s15 + $0x7a0] sm:$0xff]  }
 0x181   : > { %5170 = vmatpush3.bf16.msra.mxu0 %v5763_v57  ;;  %5193 = vmatprep.subr.bf16.mxu1 %v5766_v62  ;;  %v5813_v57 = vld [vmem:[%s6249_s15 + $0x760] sm:$0xff]   ;;  %v5817_v62 = vld [vmem:[%s6249_s15 + $0x758] sm:$0xff]  }
 0x182   : > { %5171 = vmatprep.subr.bf16.mxu0 %v5765_v60  ;;  %v5815_v60 = vld [vmem:[%s6249_s15 + $0x720] sm:$0xff]  }
 0x184   : > { %5194 = vmatpush3.bf16.msra.mxu1 %v5768_v5  ;;  %v5821_v5 = vld [vmem:[%s6249_s15 + $0x750] sm:$0xff]  }
 0x185   : > { %5172 = vmatpush3.bf16.msra.mxu0 %v5767_v2  ;;  %5223 = vmatprep.subr.bf16.mxu1 %v5770_v6  ;;  %v5822_v2 = vld [vmem:[%s6249_s15 + $0x7d0] sm:$0xff]  }
 0x186   : > { %5201 = vmatprep.subr.bf16.mxu0 %v5769_v8  ;;  %v5824_v6 = vld [vmem:[%s6249_s15 + $0x790] sm:$0xff]  }
 0x187   : > { %4731 = vmatmul.mubr.msk.bf16.vlgmr.msra.gmra.mxu1 %vm6685_vm6, %v6099_v3  ;;  %vm3223_vm6 = vcmp.eq.s32.totalorder %v6763_v44, %v6347_v58  ;;  %v5823_v8 = vld [vmem:[%s6249_s15 + $0x710] sm:$0xff]   ;;  %v5857_v44 = vld [vmem:[%s6249_s15 + $0x848] sm:$0xff]  }
 0x188   : > { %4707 = vmatmul.mubr.msk.bf16.vlgmr.msra.gmra.mxu0 %vm6689_vm7, %v6099_v3  ;;  %5224 = vmatpush3.bf16.msra.mxu1 %v5772_v11  ;;  %vm4778_vm7 = vmpackc.low %vm2840_vm2, %vm2838_vm1  ;;  %v5828_v11 = vld [vmem:[%s6249_s15 + $0x788] sm:$0xff]  }
 0x189   : > { %5202 = vmatpush3.bf16.msra.mxu0 %v5771_v10  ;;  %5225 = vmatprep.subr.bf16.mxu1 %v5774_v12  ;;  %vm4824_vm9 = vmpackc.low %vm3223_vm6, %vm3221_vm5  ;;  %v5825_v10 = vld [vmem:[%s6249_s15 + $0x748] sm:$0xff]  }
 0x18a   : > { %5203 = vmatprep.subr.bf16.mxu0 %v5773_v13  ;;  %4753 = vmatprep.mubr.msk.bf16.mxu0 %vm4752_vm12, %v6099_v3  ;;  %v5827_v12 = vld [vmem:[%s6249_s15 + $0x708] sm:$0xff]   ;;  %v5830_v13 = vld [vmem:[%s6249_s15 + $0x7c0] sm:$0xff]   ;;  %vm3031_vm12 = vcmp.eq.s32.totalorder %v6747_v34, %v6343_v54  ;;  %v5850_v34 = vld [vmem:[%s6249_s15 + $0x8d8] sm:$0xff]  }
 0x18b   : > { %4777 = vmatprep.mubr.msk.bf16.mxu1 %vm4776_vm13, %v6099_v3  ;;  %vm3029_vm13 = vcmp.eq.s32.totalorder %v6749_v35, %v6343_v54  ;;  %v5849_v35 = vld [vmem:[%s6249_s15 + $0x858] sm:$0xff]  }
 0x18c   : > { %5226 = vmatpush3.bf16.msra.mxu1 %v5776_v14  ;;  %v5829_v14 = vld [vmem:[%s6249_s15 + $0x740] sm:$0xff]   ;;  %vm4802_vm3 = vmpackc.low %vm3031_vm12, %vm3029_vm13 }
 0x18d   : > { %5204 = vmatpush3.bf16.msra.mxu0 %v5775_v15  ;;  %5227 = vmatprep.subr.bf16.mxu1 %v5778_v16  ;;  %v6813_v15 = vpop.permute.xlu1 %3409  ;;  %v5832_v16 = vld [vmem:[%s6249_s15 + $0x780] sm:$0xff]  }
 0x18e   : > { %5205 = vmatprep.subr.bf16.mxu0 %v5777_v17  ;;  %v5831_v17 = vld [vmem:[%s6249_s15 + $0x700] sm:$0xff]  }
 0x190   : > { %5228 = vmatpush3.bf16.msra.mxu1 %v5780_v1  ;;  %v5833_v1 = vld [vmem:[%s6249_s15 + $0x878] sm:$0xff]  }
 0x191   : > { %5206 = vmatpush3.bf16.msra.mxu0 %v5779_v18  ;;  %5229 = vmatprep.subr.bf16.mxu1 %v5782_v19  ;;  %v5834_v18 = vld [vmem:[%s6249_s15 + $0x8f8] sm:$0xff]   ;;  %v6823_v19 = vpop.permute.xlu1 %3600 }
 0x192   : > { %5207 = vmatprep.subr.bf16.mxu0 %v5781_v20  ;;  %v6825_v20 = vpop.permute.xlu0 %3597  ;;  %vm3605_vm1 = vcmp.eq.s32.totalorder %v6823_v19, %v6347_v58  ;;  %vm3604_vm6 = vcmp.eq.s32.totalorder %v6823_v19, %v6343_v54  ;;  %v5892_v19 = vld [vmem:[%s6249_s15 + $0x988] sm:$0xff]  }
 0x193   : > { %vm3603_vm2 = vcmp.eq.s32.totalorder %v6825_v20, %v6347_v58 }
 0x194   : > { %5230 = vmatpush3.bf16.msra.mxu1 %v5784_v22  ;;  %v5835_v22 = vld [vmem:[%s6249_s15 + $0x838] sm:$0xff]   ;;  %vm4872_vm5 = vmpackc.low %vm3605_vm1, %vm3603_vm2 }
 0x195   : > { %5208 = vmatpush3.bf16.msra.mxu0 %v5783_v21  ;;  %5231 = vmatprep.subr.bf16.mxu1 %v5786_v23  ;;  %v5836_v21 = vld [vmem:[%s6249_s15 + $0x8b8] sm:$0xff]   ;;  %v5838_v23 = vld [vmem:[%s6249_s15 + $0x8f0] sm:$0xff]  }
 0x196   : > { %5209 = vmatprep.subr.bf16.mxu0 %v5785_v24  ;;  %v5837_v24 = vld [vmem:[%s6249_s15 + $0x870] sm:$0xff]  }
 0x198   : > { %5232 = vmatpush3.bf16.msra.mxu1 %v5788_v25  ;;  %v5839_v25 = vld [vmem:[%s6249_s15 + $0x830] sm:$0xff]  }
 0x199   : > { %5210 = vmatpush3.bf16.msra.mxu0 %v5787_v4  ;;  %5233 = vmatprep.subr.bf16.mxu1 %v5790_v26  ;;  %v5840_v4 = vld [vmem:[%s6249_s15 + $0x8b0] sm:$0xff]   ;;  %v5842_v26 = vld [vmem:[%s6249_s15 + $0x8e8] sm:$0xff]  }
 0x19a   : > { %5211 = vmatprep.subr.bf16.mxu0 %v5789_v27  ;;  %v5841_v27 = vld [vmem:[%s6249_s15 + $0x868] sm:$0xff]  }
 0x19c   : > { %5234 = vmatpush3.bf16.msra.mxu1 %v5792_v29  ;;  %v5843_v29 = vld [vmem:[%s6249_s15 + $0x828] sm:$0xff]  }
 0x19d   : > { %5212 = vmatpush3.bf16.msra.mxu0 %v5791_v28  ;;  %5235 = vmatprep.subr.bf16.mxu1 %v5794_v30  ;;  %v5844_v28 = vld [vmem:[%s6249_s15 + $0x8a8] sm:$0xff]   ;;  %v5846_v30 = vld [vmem:[%s6249_s15 + $0x8e0] sm:$0xff]  }
 0x19e   : > { %5213 = vmatprep.subr.bf16.mxu0 %v5793_v31  ;;  %v5845_v31 = vld [vmem:[%s6249_s15 + $0x860] sm:$0xff]  }
 0x1a0   : > { %5236 = vmatpush3.bf16.msra.mxu1 %v5796_v33  ;;  %v5847_v33 = vld [vmem:[%s6249_s15 + $0x820] sm:$0xff]  }
 0x1a1   : > { %5214 = vmatpush3.bf16.msra.mxu0 %v5795_v32  ;;  %5237 = vmatprep.subr.bf16.mxu1 %v5798_v36  ;;  %v5848_v32 = vld [vmem:[%s6249_s15 + $0x8a0] sm:$0xff]   ;;  %v5852_v36 = vld [vmem:[%s6249_s15 + $0x898] sm:$0xff]  }
 0x1a2   : > { %5215 = vmatprep.subr.bf16.mxu0 %v5797_v37  ;;  %v5851_v37 = vld [vmem:[%s6249_s15 + $0x818] sm:$0xff]  }
 0x1a4   : > { %5238 = vmatpush3.bf16.msra.mxu1 %v5800_v40  ;;  %v6863_v40 = vpop.permute.xlu1 %3788 }
 0x1a5   : > { %5216 = vmatpush3.bf16.msra.mxu0 %v5799_v39  ;;  %5267 = vmatprep.subr.bf16.mxu1 %v5802_v41  ;;  %v5853_v39 = vld [vmem:[%s6249_s15 + $0x850] sm:$0xff]   ;;  %vm3794_vm11 = vcmp.eq.s32.totalorder %v6863_v40, %v6347_v58 }
 0x1a6   : > { %5245 = vmatprep.subr.bf16.mxu0 %v5801_v42  ;;  %v5856_v41 = vld [vmem:[%s6249_s15 + $0x890] sm:$0xff]  }
 0x1a7   : > { %4779 = vmatmul.mubr.msk.bf16.vlgmr.msra.gmra.mxu1 %vm4778_vm7, %v6099_v3  ;;  %v5855_v42 = vld [vmem:[%s6249_s15 + $0x810] sm:$0xff]   ;;  %vm3602_vm7 = vcmp.eq.s32.totalorder %v6825_v20, %v6343_v54  ;;  %v5891_v20 = vld [vmem:[%s6249_s15 + $0x908] sm:$0xff]  }
 0x1a8   : > { %4755 = vmatmul.mubr.msk.bf16.vlgmr.msra.gmra.mxu0 %vm6753_vm0, %v6099_v3  ;;  %5268 = vmatpush3.bf16.msra.mxu1 %v5804_v46  ;;  %vm3414_vm0 = vcmp.eq.s32.totalorder %v6813_v15, %v6347_v58  ;;  %v6870_v46 = vpop.permute.xlu1 %3979  ;;  %vm4874_vm10 = vmpackc.low %vm3604_vm6, %vm3602_vm7 }
 0x1a9   : > { %5246 = vmatpush3.bf16.msra.mxu0 %v5803_v45  ;;  %5269 = vmatprep.subr.bf16.mxu1 %v5806_v47  ;;  %vm4848_vm4 = vmpackc.low %vm3414_vm0, %vm3412_vm15  ;;  %v5860_v45 = vld [vmem:[%s6249_s15 + $0x888] sm:$0xff]   ;;  %vm3985_vm13 = vcmp.eq.s32.totalorder %v6870_v46, %v6347_v58  ;;  %vm3984_vm2 = vcmp.eq.s32.totalorder %v6870_v46, %v6343_v54 }
 0x1aa   : > { %5247 = vmatprep.subr.bf16.mxu0 %v5805_v48  ;;  %4801 = vmatprep.mubr.msk.bf16.mxu0 %vm4800_vm8, %v6099_v3  ;;  %v5859_v47 = vld [vmem:[%s6249_s15 + $0x808] sm:$0xff]   ;;  %v5862_v48 = vld [vmem:[%s6249_s15 + $0x8c0] sm:$0xff]   ;;  %vm3411_vm8 = vcmp.eq.s32.totalorder %v6804_v7, %v6343_v54 }
 0x1ab   : > { %4825 = vmatprep.mubr.msk.bf16.mxu1 %vm4824_vm9, %v6099_v3  ;;  %vm3413_vm9 = vcmp.eq.s32.totalorder %v6813_v15, %v6343_v54  ;;  %v5877_v7 = vld [vmem:[%s6249_s15 + $0x960] sm:$0xff]   ;;  %v5885_v15 = vld [vmem:[%s6249_s15 + $0x950] sm:$0xff]  }
 0x1ac   : > { %5270 = vmatpush3.bf16.msra.mxu1 %v5808_v50  ;;  %v5864_v50 = vld [vmem:[%s6249_s15 + $0x880] sm:$0xff]   ;;  %vm4850_vm15 = vmpackc.low %vm3413_vm9, %vm3411_vm8 }
 0x1ad   : > { %5248 = vmatpush3.bf16.msra.mxu0 %v5807_v49  ;;  %5271 = vmatprep.subr.bf16.mxu1 %v5810_v51  ;;  %v5861_v49 = vld [vmem:[%s6249_s15 + $0x840] sm:$0xff]  }
 0x1ae   : > { %5249 = vmatprep.subr.bf16.mxu0 %v5809_v52  ;;  %v5863_v51 = vld [vmem:[%s6249_s15 + $0x800] sm:$0xff]   ;;  %v5866_v52 = vld [vmem:[%s6249_s15 + $0x9f8] sm:$0xff]  }
 0x1b0   : > { %5272 = vmatpush3.bf16.msra.mxu1 %v5812_v55  ;;  %v5865_v55 = vld [vmem:[%s6249_s15 + $0x978] sm:$0xff]  }
 0x1b1   : > { %5250 = vmatpush3.bf16.msra.mxu0 %v5811_v53  ;;  %5273 = vmatprep.subr.bf16.mxu1 %v5814_v56  ;;  %v6882_v53 = vpop.permute.xlu0 %3791  ;;  %v6885_v56 = vpop.permute.xlu1 %3982 }
 0x1b2   : > { %5251 = vmatprep.subr.bf16.mxu0 %v5813_v57  ;;  %v5868_v57 = vld [vmem:[%s6249_s15 + $0x9b8] sm:$0xff]   ;;  %vm3796_vm12 = vcmp.eq.s32.totalorder %v6882_v53, %v6347_v58 }
 0x1b3   : > { %vm4896_vm0 = vmpackc.low %vm3796_vm12, %vm3794_vm11 }
 0x1b4   : > { %5274 = vmatpush3.bf16.msra.mxu1 %v5816_v59  ;;  %v5867_v59 = vld [vmem:[%s6249_s15 + $0x938] sm:$0xff]  }
 0x1b5   : > { %5252 = vmatpush3.bf16.msra.mxu0 %v5815_v60  ;;  %5275 = vmatprep.subr.bf16.mxu1 %v5818_v61  ;;  %v5870_v60 = vld [vmem:[%s6249_s15 + $0x9f0] sm:$0xff]  }
 0x1b6   : > { %5253 = vmatprep.subr.bf16.mxu0 %v5817_v62  ;;  %v5869_v61 = vld [vmem:[%s6249_s15 + $0x970] sm:$0xff]  }
 0x1b7   : > { %v5872_v62 = vld [vmem:[%s6249_s15 + $0x9b0] sm:$0xff]  }
 0x1b8   : > { %5276 = vmatpush3.bf16.msra.mxu1 %v5820_v63  ;;  %v5871_v63 = vld [vmem:[%s6249_s15 + $0x930] sm:$0xff]  }
 0x1b9   : > { %5254 = vmatpush3.bf16.msra.mxu0 %v5819_v0  ;;  %5277 = vmatprep.subr.bf16.mxu1 %v5822_v2  ;;  %v5873_v0 = vld [vmem:[%s6249_s15 + $0x968] sm:$0xff]  }
 0x1ba   : > { %5255 = vmatprep.subr.bf16.mxu0 %v5821_v5  ;;  %v5876_v2 = vld [vmem:[%s6249_s15 + $0x9a8] sm:$0xff]  }
 0x1bb   : > { %v5875_v5 = vld [vmem:[%s6249_s15 + $0x928] sm:$0xff]  }
 0x1bc   : > { %5278 = vmatpush3.bf16.msra.mxu1 %v5824_v6  ;;  %v5878_v6 = vld [vmem:[%s6249_s15 + $0x9e0] sm:$0xff]  }
 0x1bd   : > { %5256 = vmatpush3.bf16.msra.mxu0 %v5823_v8  ;;  %5279 = vmatprep.subr.bf16.mxu1 %v5826_v9  ;;  %v5880_v8 = vld [vmem:[%s6249_s15 + $0x9a0] sm:$0xff]  }
 0x1be   : > { %5257 = vmatprep.subr.bf16.mxu0 %v5825_v10  ;;  %v5879_v9 = vld [vmem:[%s6249_s15 + $0x920] sm:$0xff]   ;;  %v5882_v10 = vld [vmem:[%s6249_s15 + $0x9d8] sm:$0xff]  }
 0x1c0   : > { %5280 = vmatpush3.bf16.msra.mxu1 %v5828_v11  ;;  %v5881_v11 = vld [vmem:[%s6249_s15 + $0x958] sm:$0xff]  }
 0x1c1   : > { %5258 = vmatpush3.bf16.msra.mxu0 %v5827_v12  ;;  %5281 = vmatprep.subr.bf16.mxu1 %v5830_v13  ;;  %v5884_v12 = vld [vmem:[%s6249_s15 + $0x998] sm:$0xff]  }
 0x1c2   : > { %5259 = vmatprep.subr.bf16.mxu0 %v5829_v14  ;;  %v5883_v13 = vld [vmem:[%s6249_s15 + $0x918] sm:$0xff]   ;;  %v5886_v14 = vld [vmem:[%s6249_s15 + $0x9d0] sm:$0xff]  }
 0x1c4   : > { %5282 = vmatpush3.bf16.msra.mxu1 %v5832_v16  ;;  %v5888_v16 = vld [vmem:[%s6249_s15 + $0x990] sm:$0xff]  }
 0x1c5   : > { %5260 = vmatpush3.bf16.msra.mxu0 %v5831_v17  ;;  %5311 = vmatprep.subr.bf16.mxu1 %v5834_v18  ;;  %v5887_v17 = vld [vmem:[%s6249_s15 + $0x910] sm:$0xff]   ;;  %v5890_v18 = vld [vmem:[%s6249_s15 + $0x9c8] sm:$0xff]  }
 0x1c6   : > { %5289 = vmatprep.subr.bf16.mxu0 %v5833_v1  ;;  %v5889_v1 = vld [vmem:[%s6249_s15 + $0x948] sm:$0xff]  }
 0x1c7   : > { %4827 = vmatmul.mubr.msk.bf16.vlgmr.msra.gmra.mxu1 %vm4826_vm14, %v6099_v3  ;;  %vm3987_vm14 = vcmp.eq.s32.totalorder %v6885_v56, %v6347_v58  ;;  %v5874_v58 = vld [vmem:[%s6249_s15 + $0x9e8] sm:$0xff]  }
 0x1c8   : > { %4803 = vmatmul.mubr.msk.bf16.vlgmr.msra.gmra.mxu0 %vm4802_vm3, %v6099_v3  ;;  %5312 = vmatpush3.bf16.msra.mxu1 %v5836_v21  ;;  %vm4920_vm1 = vmpackc.low %vm3987_vm14, %vm3985_vm13  ;;  %v5894_v21 = vld [vmem:[%s6249_s15 + $0x9c0] sm:$0xff]   ;;  %vm3986_vm3 = vcmp.eq.s32.totalorder %v6885_v56, %v6343_v54 }
 0x1c9   : > { %5290 = vmatpush3.bf16.msra.mxu0 %v5835_v22  ;;  %5313 = vmatprep.subr.bf16.mxu1 %v5838_v23  ;;  %v5893_v22 = vld [vmem:[%s6249_s15 + $0x940] sm:$0xff]   ;;  %vm4922_vm6 = vmpackc.low %vm3986_vm3, %vm3984_vm2 }
 0x1ca   : > { %5291 = vmatprep.subr.bf16.mxu0 %v5837_v24  ;;  %4849 = vmatprep.mubr.msk.bf16.mxu0 %vm4848_vm4, %v6099_v3  ;;  %v5896_v23 = vld [vmem:[%s6249_s15 + $0x980] sm:$0xff]   ;;  %vm3793_vm4 = vcmp.eq.s32.totalorder %v6863_v40, %v6343_v54 }
 0x1cb   : > { %4873 = vmatprep.mubr.msk.bf16.mxu1 %vm4872_vm5, %v6099_v3  ;;  %v5895_v24 = vld [vmem:[%s6249_s15 + $0x900] sm:$0xff]   ;;  %vm3795_vm5 = vcmp.eq.s32.totalorder %v6882_v53, %v6343_v54 }
 0x1cc   : > { %5314 = vmatpush3.bf16.msra.mxu1 %v5840_v4  ;;  %vm4898_vm7 = vmpackc.low %vm3795_vm5, %vm3793_vm4  ;;  %v4953_v4 = vpop.f32.mrf.mxu0 }
 0x1cd   : > { %5292 = vmatpush3.bf16.msra.mxu0 %v5839_v25  ;;  %5315 = vmatprep.subr.bf16.mxu1 %v5842_v26  ;;  %v4975_v25 = vpop.f32.mrf.mxu1 }
 0x1ce   : > { %5293 = vmatprep.subr.bf16.mxu0 %v5841_v27  ;;  %v4954_v26 = vpop.f32.mrf.mxu0 }
 0x1cf   : > { %v4976_v27 = vpop.f32.mrf.mxu1 }
 0x1d0   : > { %5316 = vmatpush3.bf16.msra.mxu1 %v5844_v28  ;;  %v4956_v28 = vpop.f32.mrf.mxu0 }
 0x1d1   : > { %5294 = vmatpush3.bf16.msra.mxu0 %v5843_v29  ;;  %5317 = vmatprep.subr.bf16.mxu1 %v5846_v30  ;;  %v4978_v29 = vpop.f32.mrf.mxu1 }
 0x1d2   : > { %5295 = vmatprep.subr.bf16.mxu0 %v5845_v31  ;;  %v4957_v30 = vpop.f32.mrf.mxu0 }
 0x1d3   : > { %v4979_v31 = vpop.f32.mrf.mxu1 }
 0x1d4   : > { %5318 = vmatpush3.bf16.msra.mxu1 %v5848_v32  ;;  %v4997_v32 = vpop.f32.mrf.mxu0 }
 0x1d5   : > { %5296 = vmatpush3.bf16.msra.mxu0 %v5847_v33  ;;  %5319 = vmatprep.subr.bf16.mxu1 %v5850_v34  ;;  %v5019_v33 = vpop.f32.mrf.mxu1 }
 0x1d6   : > { %5297 = vmatprep.subr.bf16.mxu0 %v5849_v35  ;;  %v4998_v34 = vpop.f32.mrf.mxu0 }
 0x1d7   : > { %v5020_v54 = vpop.f32.mrf.mxu1 }
 0x1d8   : > { %5320 = vmatpush3.bf16.msra.mxu1 %v5852_v36  ;;  %v5000_v35 = vpop.f32.mrf.mxu0 }
 0x1d9   : > { %5298 = vmatpush3.bf16.msra.mxu0 %v5851_v37  ;;  %5321 = vmatprep.subr.bf16.mxu1 %v5854_v38  ;;  %v5022_v36 = vpop.f32.mrf.mxu1 }
 0x1da   : > { %5299 = vmatprep.subr.bf16.mxu0 %v5853_v39  ;;  %v5001_v37 = vpop.f32.mrf.mxu0 }
 0x1db   : > { %v5023_v38 = vpop.f32.mrf.mxu1 }
 0x1dc   : > { %5322 = vmatpush3.bf16.msra.mxu1 %v5856_v41 }
 0x1dd   : > { %5300 = vmatpush3.bf16.msra.mxu0 %v5855_v42  ;;  %5323 = vmatprep.subr.bf16.mxu1 %v5858_v43 }
 0x1de   : > { %5301 = vmatprep.subr.bf16.mxu0 %v5857_v44 }
 0x1e0   : > { %5324 = vmatpush3.bf16.msra.mxu1 %v5860_v45 }
 0x1e1   : > { %5302 = vmatpush3.bf16.msra.mxu0 %v5859_v47  ;;  %5325 = vmatprep.subr.bf16.mxu1 %v5862_v48 }
 0x1e2   : > { %5303 = vmatprep.subr.bf16.mxu0 %v5861_v49 }
 0x1e4   : > { %5326 = vmatpush3.bf16.msra.mxu1 %v5864_v50 }
 0x1e5   : > { %5304 = vmatpush3.bf16.msra.mxu0 %v5863_v51  ;;  %5355 = vmatprep.subr.bf16.mxu1 %v5866_v52 }
 0x1e6   : > { %5333 = vmatprep.subr.bf16.mxu0 %v5865_v55 }
 0x1e7   : > { %4875 = vmatmul.mubr.msk.bf16.vlgmr.msra.gmra.mxu1 %vm4874_vm10, %v6099_v3  ;;  %v5063_v40 = vpop.f32.mrf.mxu1 }
 0x1e8   : > { %4851 = vmatmul.mubr.msk.bf16.vlgmr.msra.gmra.mxu0 %vm4850_vm15, %v6099_v3  ;;  %5356 = vmatpush3.bf16.msra.mxu1 %v5868_v57  ;;  %v5041_v39 = vpop.f32.mrf.mxu0 }
 0x1e9   : > { %5334 = vmatpush3.bf16.msra.mxu0 %v5867_v59  ;;  %5357 = vmatprep.subr.bf16.mxu1 %v5870_v60 }
 0x1ea   : > { %5335 = vmatprep.subr.bf16.mxu0 %v5869_v61  ;;  %4897 = vmatprep.mubr.msk.bf16.mxu0 %vm4896_vm0, %v6099_v3  ;;  %v5042_v41 = vpop.f32.mrf.mxu0 }
 0x1eb   : > { %4921 = vmatprep.mubr.msk.bf16.mxu1 %vm4920_vm1, %v6099_v3 }
 0x1ec   : > { %5358 = vmatpush3.bf16.msra.mxu1 %v5872_v62  ;;  %v5044_v42 = vpop.f32.mrf.mxu0 }
 0x1ed   : > { %5336 = vmatpush3.bf16.msra.mxu0 %v5871_v63  ;;  %5359 = vmatprep.subr.bf16.mxu1 %v5874_v58 }
 0x1ee   : > { %5337 = vmatprep.subr.bf16.mxu0 %v5873_v0  ;;  %v5045_v44 = vpop.f32.mrf.mxu0 }
 0x1f0   : > { %5360 = vmatpush3.bf16.msra.mxu1 %v5876_v2 }
 0x1f1   : > { %5338 = vmatpush3.bf16.msra.mxu0 %v5875_v5  ;;  %5361 = vmatprep.subr.bf16.mxu1 %v5878_v6  ;;  %v4955_v5 = vadd.f32 %v4954_v26, %v4953_v4  ;;  %v5043_v4 = vadd.f32 %v5042_v41, %v5041_v39 }
 0x1f2   : > { %5339 = vmatprep.subr.bf16.mxu0 %v5877_v7  ;;  %v347_v7 = vld [vmem:[#allocation2] sm:$0xff] }
 0x1f4   : > { %5362 = vmatpush3.bf16.msra.mxu1 %v5880_v8 }
 0x1f5   : > { %5340 = vmatpush3.bf16.msra.mxu0 %v5879_v9  ;;  %5363 = vmatprep.subr.bf16.mxu1 %v5882_v10  ;;  %v538_v9 = vadd.f32 %v4955_v5, %v347_v7  ;;  %v4958_v10 = vadd.f32 %v4957_v30, %v4956_v28  ;;  %v5024_v7 = vadd.f32 %v5023_v38, %v5022_v36 }
 0x1f6   : > { %5341 = vmatprep.subr.bf16.mxu0 %v5881_v11 }
 0x1f8   : > { %5364 = vmatpush3.bf16.msra.mxu1 %v5884_v12  ;;  %v348_v12 = vld [vmem:[#allocation2 + $0x8] sm:$0xff] }
 0x1f9   : > { %5342 = vmatpush3.bf16.msra.mxu0 %v5883_v13  ;;  %5365 = vmatprep.subr.bf16.mxu1 %v5886_v14  ;;  %v4977_v13 = vadd.f32 %v4976_v27, %v4975_v25  ;;  %v4999_v14 = vadd.f32 %v4998_v34, %v4997_v32  ;;  %v5046_v25 = vadd.f32 %v5045_v44, %v5044_v42 }
 0x1fa   : > { %5343 = vmatprep.subr.bf16.mxu0 %v5885_v15 }
 0x1fc   : > { %5366 = vmatpush3.bf16.msra.mxu1 %v5888_v16  ;;  %v729_v16 = vadd.f32 %v4977_v13, %v538_v9 }
 0x1fd   : > { %5344 = vmatpush3.bf16.msra.mxu0 %v5887_v17  ;;  %5367 = vmatprep.subr.bf16.mxu1 %v5890_v18  ;;  %v539_v17 = vadd.f32 %v4958_v10, %v348_v12 }
 0x1fe   : > { %5345 = vmatprep.subr.bf16.mxu0 %v5889_v1 }
 0x200   : > { %5368 = vmatpush3.bf16.msra.mxu1 %v5892_v19  ;;  %v4980_v19 = vadd.f32 %v4979_v31, %v4978_v29 }
 0x201   : > { %5346 = vmatpush3.bf16.msra.mxu0 %v5891_v20  ;;  %5369 = vmatprep.subr.bf16.mxu1 %v5894_v21  ;;  %v920_v20 = vadd.f32 %v4999_v14, %v729_v16  ;;  %v5002_v21 = vadd.f32 %v5001_v37, %v5000_v35 }
 0x202   : > { %5347 = vmatprep.subr.bf16.mxu0 %v5893_v22 }
 0x204   : > { %5370 = vmatpush3.bf16.msra.mxu1 %v5896_v23  ;;  %v730_v23 = vadd.f32 %v4980_v19, %v539_v17 }
 0x205   : > { %5348 = vmatpush3.bf16.msra.mxu0 %v5895_v24  ;;  %v5021_v24 = vadd.f32 %v5020_v54, %v5019_v33 }
 0x206   : > { %v921_v28 = vadd.f32 %v5002_v21, %v730_v23 }
 0x207   : > { %4923 = vmatmul.mubr.msk.bf16.vlgmr.msra.gmra.mxu1 %vm4922_vm6, %v6099_v3  ;;  %v1111_v5 = vadd.f32 %v5021_v24, %v920_v20 }
 0x208   : > { %4899 = vmatmul.mubr.msk.bf16.vlgmr.msra.gmra.mxu0 %vm4898_vm7, %v6099_v3  ;;  %v5064_v3 = vpop.f32.mrf.mxu1  ;;  %v5085_v46 = vpop.f32.mrf.mxu0  ;;  %v1112_v32 = vadd.f32 %v5024_v7, %v921_v28 }
 0x209   : > { %v5065_v34 = vadd.f32 %v5064_v3, %v5063_v40 }
 0x20a   : > { %v5066_v43 = vpop.f32.mrf.mxu1  ;;  %v5086_v48 = vpop.f32.mrf.mxu0  ;;  %v1303_v29 = vadd.f32 %v5046_v25, %v1112_v32 }
 0x20b   : > { %v5087_v9 = vadd.f32 %v5086_v48, %v5085_v46 }
 0x20c   : > { %v5067_v45 = vpop.f32.mrf.mxu1  ;;  %v5088_v50 = vpop.f32.mrf.mxu0 }
 0x20d   : > { %v5068_v35 = vadd.f32 %v5067_v45, %v5066_v43 }
 0x20e   : > { %v5107_v47 = vpop.f32.mrf.mxu1  ;;  %v5089_v52 = vpop.f32.mrf.mxu0 }
 0x20f   : > { %v5090_v13 = vadd.f32 %v5089_v52, %v5088_v50  ;;  %v1494_v39 = vadd.f32 %v5068_v35, %v1303_v29 }
 0x210   : > { %v5108_v49 = vpop.f32.mrf.mxu1 }
 0x211   : > { %v5109_v41 = vadd.f32 %v5108_v49, %v5107_v47  ;;  %v1685_v38 = vadd.f32 %v5090_v13, %v1494_v39 }
 0x212   : > { %v6943_v51 = vpop.f32.mrf.mxu1 }
 0x214   : > { %v5111_v53 = vpop.f32.mrf.mxu1 }
 0x215   : > { %v5112_v44 = vadd.f32 %v5111_v53, %v6943_v51 }
 0x217   : > { %v1876_v48 = vadd.f32 %v5112_v44, %v1685_v38 }
 0x227   : > { %v6945_v56 = vpop.f32.mrf.mxu1 }
 0x228   : > { %v5129_v55 = vpop.f32.mrf.mxu0 }
 0x229   : > { %v5152_v59 = vpop.f32.mrf.mxu1 }
 0x22a   : > { %v5130_v57 = vpop.f32.mrf.mxu0 }
 0x22b   : > { %v6947_v61 = vpop.f32.mrf.mxu1  ;;  %v5131_v14 = vadd.f32 %v5130_v57, %v5129_v55 }
 0x22c   : > { %v5132_v60 = vpop.f32.mrf.mxu0 }
 0x22d   : > { %v6949_v63 = vpop.f32.mrf.mxu1 }
 0x22e   : > { %v5133_v62 = vpop.f32.mrf.mxu0  ;;  %v5156_v47 = vadd.f32 %v6949_v63, %v6947_v61 }
 0x22f   : > { %v5134_v3 = vadd.f32 %v5133_v62, %v5132_v60 }
 0x231   : > { %v2067_v52 = vadd.f32 %v5134_v3, %v1876_v48 }
 0x233   : > { %v2258_v19 = vadd.f32 %v5156_v47, %v2067_v52 }
 0x247   : > { %v6951_v0 = vpop.f32.mrf.mxu1 }
 0x248   : > { %v5173_v58 = vpop.f32.mrf.mxu0 }
 0x249   : > { %v6953_v6 = vpop.f32.mrf.mxu1 }
 0x24a   : > { %v5174_v2 = vpop.f32.mrf.mxu0  ;;  %v5197_v51 = vadd.f32 %v6953_v6, %v6951_v0 }
 0x24b   : > { %v6955_v11 = vpop.f32.mrf.mxu1  ;;  %v5175_v43 = vadd.f32 %v5174_v2, %v5173_v58 }
 0x24c   : > { %v5176_v8 = vpop.f32.mrf.mxu0  ;;  %7010 = vst [vmem:[#allocation13_spill] sm:$0xff] %v6955_v11  ;;  %v1302_v11 = vadd.f32 %v5043_v4, %v1111_v5 }
 0x24d   : > { %v5199_v18 = vpop.f32.mrf.mxu1 }
 0x24e   : > { %v5177_v15 = vpop.f32.mrf.mxu0  ;;  %v1493_v12 = vadd.f32 %v5065_v34, %v1302_v11  ;;  %v5153_v11 = vadd.f32 %v5152_v59, %v6945_v56 }
 0x24f   : > { %v5178_v55 = vadd.f32 %v5177_v15, %v5176_v8 }
 0x250   : > { %v1684_v37 = vadd.f32 %v5087_v9, %v1493_v12 }
 0x251   : > { %v2449_v56 = vadd.f32 %v5178_v55, %v2258_v19 }
 0x252   : > { %v1875_v36 = vadd.f32 %v5109_v41, %v1684_v37 }
 0x253   : > { %v7011_v58 = vld [vmem:[#allocation13_spill] sm:$0xff] }
 0x254   : > { %v2066_v40 = vadd.f32 %v5131_v14, %v1875_v36  ;;  %v5200_v2 = vadd.f32 %v5199_v18, %v7011_v58 }
 0x256   : > { %v2257_v50 = vadd.f32 %v5153_v11, %v2066_v40  ;;  %v2640_v4 = vadd.f32 %v5200_v2, %v2449_v56 }
 0x258   : > { %v2448_v49 = vadd.f32 %v5175_v43, %v2257_v50 }
 0x25a   : > { %v2639_v20 = vadd.f32 %v5197_v51, %v2448_v49 }
 0x267   : > { %v5239_v22 = vpop.f32.mrf.mxu1 }
 0x268   : > { %v5217_v1 = vpop.f32.mrf.mxu0 }
 0x269   : > { %v5240_v30 = vpop.f32.mrf.mxu1 }
 0x26a   : > { %v5218_v26 = vpop.f32.mrf.mxu0  ;;  %v5241_v61 = vadd.f32 %v5240_v30, %v5239_v22 }
 0x26b   : > { %v5242_v10 = vpop.f32.mrf.mxu1  ;;  %v5219_v53 = vadd.f32 %v5218_v26, %v5217_v1 }
 0x26c   : > { %v5220_v27 = vpop.f32.mrf.mxu0 }
 0x26d   : > { %v5243_v33 = vpop.f32.mrf.mxu1  ;;  %v2830_v21 = vadd.f32 %v5219_v53, %v2639_v20 }
 0x26e   : > { %v5221_v31 = vpop.f32.mrf.mxu0  ;;  %v5244_v7 = vadd.f32 %v5243_v33, %v5242_v10 }
 0x26f   : > { %v5222_v23 = vadd.f32 %v5221_v31, %v5220_v27  ;;  %v3021_v15 = vadd.f32 %v5241_v61, %v2830_v21 }
 0x271   : > { %v2831_v5 = vadd.f32 %v5222_v23, %v2640_v4 }
 0x273   : > { %v3022_v26 = vadd.f32 %v5244_v7, %v2831_v5 }
 0x287   : > { %v5283_v16 = vpop.f32.mrf.mxu1 }
 0x288   : > { %v5261_v54 = vpop.f32.mrf.mxu0 }
 0x289   : > { %v5284_v46 = vpop.f32.mrf.mxu1 }
 0x28a   : > { %v5262_v42 = vpop.f32.mrf.mxu0  ;;  %v5285_v25 = vadd.f32 %v5284_v46, %v5283_v16 }
 0x28b   : > { %v5286_v17 = vpop.f32.mrf.mxu1  ;;  %v5263_v63 = vadd.f32 %v5262_v42, %v5261_v54 }
 0x28c   : > { %v5264_v45 = vpop.f32.mrf.mxu0 }
 0x28d   : > { %v5287_v60 = vpop.f32.mrf.mxu1  ;;  %v3212_v0 = vadd.f32 %v5263_v63, %v3021_v15 }
 0x28e   : > { %v5265_v57 = vpop.f32.mrf.mxu0  ;;  %v5288_v27 = vadd.f32 %v5287_v60, %v5286_v17 }
 0x28f   : > { %v5266_v6 = vadd.f32 %v5265_v57, %v5264_v45  ;;  %v3403_v9 = vadd.f32 %v5285_v25, %v3212_v0 }
 0x291   : > { %v3213_v18 = vadd.f32 %v5266_v6, %v3022_v26 }
 0x293   : > { %v3404_v35 = vadd.f32 %v5288_v27, %v3213_v18 }
 0x2a7   : > { %v5327_v59 = vpop.f32.mrf.mxu1 }
 0x2a8   : > { %v5305_v62 = vpop.f32.mrf.mxu0 }
 0x2a9   : > { %v5328_v8 = vpop.f32.mrf.mxu1 }
 0x2aa   : > { %v5306_v24 = vpop.f32.mrf.mxu0  ;;  %v5329_v37 = vadd.f32 %v5328_v8, %v5327_v59 }
 0x2ab   : > { %v5330_v1 = vpop.f32.mrf.mxu1  ;;  %v5307_v32 = vadd.f32 %v5306_v24, %v5305_v62 }
 0x2ac   : > { %v5308_v28 = vpop.f32.mrf.mxu0 }
 0x2ad   : > { %v5331_v12 = vpop.f32.mrf.mxu1  ;;  %v3594_v29 = vadd.f32 %v5307_v32, %v3403_v9 }
 0x2ae   : > { %v5309_v34 = vpop.f32.mrf.mxu0  ;;  %v5332_v16 = vadd.f32 %v5331_v12, %v5330_v1 }
 0x2af   : > { %v5310_v31 = vadd.f32 %v5309_v34, %v5308_v28  ;;  %v3785_v10 = vadd.f32 %v5329_v37, %v3594_v29 }
 0x2b1   : > { %v3595_v33 = vadd.f32 %v5310_v31, %v3404_v35 }
 0x2b3   : > { %v3786_v40 = vadd.f32 %v5332_v16, %v3595_v33 }
 0x2c7   : > { %v5371_v22 = vpop.f32.mrf.mxu1 }
 0x2c8   : > { %v5349_v30 = vpop.f32.mrf.mxu0 }
 0x2c9   : > { %v5372_v13 = vpop.f32.mrf.mxu1 }
 0x2ca   : > { %v5350_v54 = vpop.f32.mrf.mxu0  ;;  %v5373_v38 = vadd.f32 %v5372_v13, %v5371_v22 }
 0x2cb   : > { %v5351_v39 = vadd.f32 %v5350_v54, %v5349_v30  ;;  %v5374_v41 = vpop.f32.mrf.mxu1 }
 0x2cc   : > { %v5352_v14 = vpop.f32.mrf.mxu0 }
 0x2cd   : > { %v3976_v36 = vadd.f32 %v5351_v39, %v3785_v10  ;;  %v5375_v44 = vpop.f32.mrf.mxu1 }
 0x2ce   : > { %v5353_v42 = vpop.f32.mrf.mxu0  ;;  %v5376_v11 = vadd.f32 %v5375_v44, %v5374_v41 }
 0x2cf   : > { %v4167_v3 = vadd.f32 %v5373_v38, %v3976_v36  ;;  %v5354_v46 = vadd.f32 %v5353_v42, %v5352_v14 }
 0x2d1   : > { %4169 = vst [vmem:[#allocation2] sm:$0xff] %v4167_v3  ;;  %v3977_v48 = vadd.f32 %v5354_v46, %v3786_v40  ;;  %4174 = sbr.rel (%p4924_p1) target bundleno = 978 (0x3d2), region = 64 }
 0x2d3   : > { %v4168_v43 = vadd.f32 %v5376_v11, %v3977_v48 }
 0x2d5   : > { %4170 = vst [vmem:[#allocation2 + $0x8] sm:$0xff] %v4168_v43 }
 0x2d6   : > { %v4213_v45 = vld [vmem:[#allocation7 + $0x78] sm:$0xff]  ;;  %v4212_v50 = vld [vmem:[#allocation7 + $0x70] sm:$0xff]  ;;  %v4211_v52 = vld [vmem:[#allocation7 + $0x68] sm:$0xff] }
 0x2d7   : > { %5395 = vmatprep.subr.mxu0 %v4213_v45  ;;  %v4210_v17 = vld [vmem:[#allocation7 + $0x60] sm:$0xff]  ;;  %v4925_v49 = vld [vmem:[#allocation5] ss:$0 sm:$0xff]  ;;  %v4208_v53 = vld [vmem:[#allocation7 + $0x50] sm:$0xff] }
 0x2d8   : > { %5396 = vmatpush3.msra.mxu0 %v4213_v45  ;;  %v4175_v47 = vld [vmem:[#allocation2] sm:$0xff]  ;;  %v4209_v55 = vld [vmem:[#allocation7 + $0x58] sm:$0xff]  ;;  %v4206_v58 = vld [vmem:[#allocation7 + $0x40] sm:$0xff] }
 0x2d9   : > { %5397 = vmatprep.subr.mxu0 %v4212_v50  ;;  %v4184_v57 = vadd.f32 %v4925_v49, %v4175_v47  ;;  %v4207_v20 = vld [vmem:[#allocation7 + $0x48] sm:$0xff]  ;;  %v4205_v2 = vld [vmem:[#allocation7 + $0x38] sm:$0xff]  ;;  %v4204_v21 = vld [vmem:[#allocation7 + $0x30] sm:$0xff] }
 0x2da   : > { %5398 = vmatpush3.msra.mxu0 %v4212_v50  ;;  %v4203_v23 = vld [vmem:[#allocation7 + $0x28] sm:$0xff]  ;;  %v4202_v24 = vld [vmem:[#allocation7 + $0x20] sm:$0xff]  ;;  %v4201_v4 = vld [vmem:[#allocation7 + $0x18] sm:$0xff] }
 0x2db   : > { %5399 = vmatprep.subr.mxu0 %v4211_v52  ;;  %v4188_v60 = vmin.f32 %v4184_v57, 0.0  ;;  %v4200_v61 = vld [vmem:[#allocation7 + $0x10] sm:$0xff]  ;;  %vm4186_vm8 = vcmp.gt.f32.partialorder %v4184_v57, 0.0  ;;  %v4199_v15 = vld [vmem:[#allocation7 + $0x8] sm:$0xff]  ;;  %v4198_v7 = vld [vmem:[#allocation7] sm:$0xff] }
 0x2dc   : > { %5400 = vmatpush3.msra.mxu0 %v4211_v52  ;;  %v4176_v19 = vld [vmem:[#allocation2 + $0x8] sm:$0xff]  ;;  %v4928_v1 = vld [vmem:[#allocation8] ss:$0 sm:$0xff] }
 0x2dd   : > { %5401 = vmatprep.subr.mxu0 %v4210_v17  ;;  %v4185_v51 = vadd.f32 %v4925_v49, %v4176_v19  ;;  %v4190_v56 = vmul.f32 1.442695, %v4188_v60 }
 0x2de   : > { %5402 = vmatpush3.msra.mxu0 %v4210_v17 }
 0x2df   : > { %5403 = vmatprep.subr.mxu0 %v4209_v55  ;;  %v4189_v62 = vmin.f32 %v4185_v51, 0.0  ;;  %5899 = vpow2.f32 %v4190_v56  ;;  %vm4187_vm9 = vcmp.gt.f32.partialorder %v4185_v51, 0.0 }
 0x2e0   : > { %5404 = vmatpush3.msra.mxu0 %v4209_v55 }
 0x2e1   : > { %5405 = vmatprep.subr.mxu0 %v4208_v53  ;;  %v4192_v59 = vmul.f32 1.442695, %v4189_v62 }
 0x2e2   : > { %5406 = vmatpush3.msra.mxu0 %v4208_v53 }
 0x2e3   : > { %5407 = vmatprep.subr.mxu0 %v4207_v20  ;;  %5901 = vpow2.f32 %v4192_v59 }
 0x2e4   : > { %5408 = vmatpush3.msra.mxu0 %v4207_v20 }
 0x2e5   : > { %5409 = vmatprep.subr.mxu0 %v4206_v58 }
 0x2e6   : > { %5410 = vmatpush3.msra.mxu0 %v4206_v58 }
 0x2e7   : > { %5411 = vmatprep.subr.mxu0 %v4205_v2 }
 0x2e8   : > { %5412 = vmatpush3.msra.mxu0 %v4205_v2 }
 0x2e9   : > { %5413 = vmatprep.subr.mxu0 %v4204_v21 }
 0x2ea   : > { %5414 = vmatpush3.msra.mxu0 %v4204_v21 }
 0x2eb   : > { %5415 = vmatprep.subr.mxu0 %v4203_v23 }
 0x2ec   : > { %5416 = vmatpush3.msra.mxu0 %v4203_v23  ;;  %v5900_v63 = vpop.eup %5899 }
 0x2ed   : > { %5417 = vmatprep.subr.mxu0 %v4202_v24  ;;  %v4926_v5 = vadd.f32 -1.0, %v5900_v63 }
 0x2ee   : > { %5418 = vmatpush3.msra.mxu0 %v4202_v24 }
 0x2ef   : > { %5419 = vmatprep.subr.mxu0 %v4201_v4  ;;  %v4196_v0 = vsel %vm4186_vm8, %v4184_v57, %v4926_v5 }
 0x2f0   : > { %v5902_v8 = vpop.eup %5901  ;;  %5420 = vmatpush3.msra.mxu0 %v4201_v4  ;;  %5427 = vmatprep.mubr.f32.mxu0 %v4196_v0 }
 0x2f1   : > { %5421 = vmatprep.subr.mxu0 %v4200_v61  ;;  %v4927_v28 = vadd.f32 -1.0, %v5902_v8 }
 0x2f2   : > { %5422 = vmatpush3.msra.mxu0 %v4200_v61 }
 0x2f3   : > { %5423 = vmatprep.subr.mxu0 %v4199_v15  ;;  %v4197_v6 = vsel %vm4187_vm9, %v4185_v51, %v4927_v28 }
 0x2f4   : > { %5424 = vmatpush3.msra.mxu0 %v4199_v15 }
 0x2f5   : > { %5425 = vmatprep.subr.mxu0 %v4198_v7 }
 0x2f6   : > { %5426 = vmatpush3.msra.mxu0 %v4198_v7 }
 0x2f7   : > { %5428 = vmatmul.mubr.f32.vlgmr.msra.gmra.mxu0 %v4197_v6 }
 0x3b7   : > { %v5429_v26 = vpop.f32.mrf.mxu0 }
 0x3b8   : > { %v4293_v25 = vadd.f32 %v5429_v26, %v4928_v1 }
 0x3b9   : > { %v4287_v32 = vpop.f32.mrf.mxu0 }
 0x3ba   : > { %v4299_v34 = vmin.f32 %v4293_v25, 0.0  ;;  %v4288_v9 = vadd.f32 %v4928_v1, %v4287_v32  ;;  %vm4297_vm10 = vcmp.gt.f32.partialorder %v4293_v25, 0.0 }
 0x3bc   : > { %v4302_v18 = vmul.f32 1.442695, %v4299_v34  ;;  %v4298_v12 = vmin.f32 %v4288_v9, 0.0  ;;  %vm4296_vm11 = vcmp.gt.f32.partialorder %v4288_v9, 0.0 }
 0x3be   : > { %5903 = vpow2.f32 %v4302_v18  ;;  %v4300_v27 = vmul.f32 1.442695, %v4298_v12 }
 0x3c0   : > { %5905 = vpow2.f32 %v4300_v27 }
 0x3cb   : > { %v5904_v29 = vpop.eup %5903 }
 0x3cc   : > { %v4930_v31 = vadd.f32 -1.0, %v5904_v29 }
 0x3cd   : > { %v5906_v22 = vpop.eup %5905 }
 0x3ce   : > { %v4307_v30 = vsel %vm4297_vm10, %v4293_v25, %v4930_v31  ;;  %v4929_v35 = vadd.f32 -1.0, %v5906_v22 }
 0x3cf   : > { %4309 = vst [vmem:[%s6994_s5 + $0x8] sm:$0xff] %v4307_v30 }
 0x3d0   : > { %v4306_v37 = vsel %vm4296_vm11, %v4288_v9, %v4929_v35 }
 0x3d1   : > { %4308 = vst [vmem:[%s6994_s5] sm:$0xff] %v4306_v37 }
 0x3d2 PF: > { %s20_s23 = sadd.s32 1, %s6071_s23   ;;  %s7012_s18 = smov %s6055_s19 }
 0x3d3   : > { %p17_p2 = scmp.ge.s32.totalorder %s20_s23, 6   ;;  %s7013_s19 = smov %s6059_s20 }
 0x3d4   : > { %s7014_s20 = smov %s6237_s9  ;;  %s7015_s21 = smov %s6067_s22 }
 0x3d5   : > { %s7016_s22 = smov %s7018_s8  ;;  %19 = sbr.rel (!%p17_p2) target bundleno = 6 (0x6), region = 103 }
 0x3da   :  { %4332 = vsyncpa [#allocation4], 1 }
 0x3db   :  { %4334 = vsyncpa [#allocation4 + $0x1], 1 }
 0x3dc   :  { %4335 = vsyncpa [#allocation6], 1 }
 0x3dd   :  { %4336 = vsyncpa [#allocation9], 1 }

</bundles_post_ra>
